<compile_context>
chip_gen: v6e
topology: v6e:2x2x1
jax: 0.10.0
libtpu: 0.0.40
codegen_flags: <defaults>
</compile_context>

<pallas_src>
import functools

import jax
import jax.numpy as jnp
from jax import lax
from jax.experimental import pallas as pl
from jax.experimental.pallas import tpu as pltpu

LN_EPS = 1e-5            # nn.LayerNorm default
NEG_INF = -1e30          # large finite negative -> no NaNs
LANE = 128
VOCAB_TILE = 512         # LM-head vocab tile (multiple of 128; review: 512-2048)


def _round_up(x, m):
    return (x + m - 1) // m * m


def _vmem_limit_bytes():
    # Re-derive the scoped-VMEM budget per chip (v5e/v6e: 128 MiB, v7x: 64 MiB physical)
    # instead of hard-coding the 32 MiB default; leave ~20% headroom for compiler scratch.
    try:
        return int(pltpu.get_tpu_info().vmem_capacity_bytes * 0.8)
    except Exception:
        return None      # fall back to the compiler default


_VMEM_LIMIT = _vmem_limit_bytes()


def _layernorm(v, w, b):
    mu = jnp.mean(v, axis=-1, keepdims=True)
    var = jnp.mean((v - mu) ** 2, axis=-1, keepdims=True)
    return (v - mu) * lax.rsqrt(var + LN_EPS) * w + b


# --------------------------------------------------------------------------
# Pallas kernels
# --------------------------------------------------------------------------
def gpt_blocks_kernel(x_ref, ln1w_ref, ln1b_ref, wqkv_ref, bqkv_ref,
                      wo_ref, bo_ref, ln2w_ref, ln2b_ref,
                      w1_ref, b1_ref, w2_ref, b2_ref, lnfw_ref, lnfb_ref,
                      out_ref, *, num_heads):
    """All pre-LN transformer blocks + final LayerNorm; grid=(batch_tiles, num_layers).

    out_ref has a layer-constant index map, so it stays VMEM-resident across the layer
    axis and is used as the carried activation buffer (residual stream in f32).  At the
    last layer the final LayerNorm is written into it, so the LM head consumes
    pre-normalized activations.
    """
    layer = pl.program_id(1)
    num_layers = pl.num_programs(1)
    bf16, f32 = jnp.bfloat16, jnp.float32

    @pl.when(layer == 0)
    def _():
        out_ref[...] = x_ref[...]          # seed resident activations with the embeddings

    x = out_ref[...]                       # (bt, S, E) f32 carried activations
    bt, S, E = x.shape
    H = num_heads
    Dh = E // H
    BS = bt * S

    # ---- LN1 (f32 stats) + fused QKV projection (bf16 operands, f32 accumulation) ----
    h = _layernorm(x, ln1w_ref[...], ln1b_ref[...])
    qkv = jnp.dot(h.reshape(BS, E).astype(bf16), wqkv_ref[...],
                  preferred_element_type=f32) + bqkv_ref[...]
    qkv = qkv.reshape(bt, S, 3 * E)
    q = qkv[..., :E]                       # 1/sqrt(Dh) already folded into Q weight/bias
    k = qkv[..., E:2 * E]
    v = qkv[..., 2 * E:]

    # causal mask hoisted out of the head loop (built once per layer)
    rows = lax.broadcasted_iota(jnp.int32, (S, S), 0)
    cols = lax.broadcasted_iota(jnp.int32, (S, S), 1)
    causal = (cols <= rows)[None]          # (1, S, S), broadcast over batch

    ctx_heads = []
    for hh in range(H):                    # static unroll; softmax kept in f32
        sl = slice(hh * Dh, (hh + 1) * Dh)
        s = jnp.einsum('bqd,bkd->bqk',
                       q[..., sl].astype(bf16), k[..., sl].astype(bf16),
                       preferred_element_type=f32)
        s = jnp.where(causal, s, NEG_INF)
        s = s - jnp.max(s, axis=-1, keepdims=True)
        p = jnp.exp(s)
        p = p * pl.reciprocal(jnp.sum(p, axis=-1, keepdims=True), approx=True)
        ctx_heads.append(jnp.einsum('bqk,bkd->bqd',
                                    p.astype(bf16), v[..., sl].astype(bf16),
                                    preferred_element_type=f32))
    # single full-K output projection (concat heads once, then (BS,E)@(E,E)) instead of
    # H partial-K (BS,Dh)@(Dh,E) dots -> better MXU contraction depth.
    ctx = jnp.concatenate(ctx_heads, axis=-1).reshape(BS, E)
    attn = jnp.dot(ctx.astype(bf16), wo_ref[...], preferred_element_type=f32) + bo_ref[...]
    x = x + attn.reshape(bt, S, E)         # attention dropout == identity (eval)

    # ---- LN2 + FFN ----
    h2 = _layernorm(x, ln2w_ref[...], ln2b_ref[...]).reshape(BS, E)
    ff = jnp.dot(h2.astype(bf16), w1_ref[...], preferred_element_type=f32) + b1_ref[...]
    ff = jnp.maximum(ff, 0.0)
    ff = jnp.dot(ff.astype(bf16), w2_ref[...], preferred_element_type=f32) + b2_ref[...]
    x = x + ff.reshape(bt, S, E)

    @pl.when(layer < num_layers - 1)
    def _():
        out_ref[...] = x                   # carry residual stream to the next layer

    @pl.when(layer == num_layers - 1)
    def _():
        # final LayerNorm fused here (hoisted out of the per-vocab-tile LM-head loop)
        out_ref[...] = _layernorm(x, lnfw_ref[...], lnfb_ref[...])


def lm_head_kernel(h_ref, w_ref, b_ref, out_ref):
    """Tied LM head on pre-normalized activations; grid tiles the (padded) vocab."""
    h = h_ref[...]                          # (B, S, E) f32, already final-LayerNormed
    B, S, E = h.shape
    logits = jnp.dot(h.reshape(B * S, E).astype(jnp.bfloat16), w_ref[...],
                     preferred_element_type=jnp.float32) + b_ref[...]
    out_ref[...] = logits.reshape(B, S, -1)  # lane-dense store (tile_v multiple of 128)


# --------------------------------------------------------------------------
# pallas_call wrappers
# --------------------------------------------------------------------------
def apply_blocks(x, params, num_heads):
    B, S, E = x.shape
    L = params['wqkv'].shape[0]
    F = params['w1'].shape[-1]
    # 2 batch tiles -> one per v7x TensorCore (batch axis marked "parallel").  On
    # single-TC chips at many layers you would use 1 tile to avoid re-streaming weights.
    n_bt = 2 if B % 2 == 0 else 1
    bt = B // n_bt

    def w_spec(*shape):
        # per-layer weight: squeeze the layer dim, stream one layer's slice per grid step
        return pl.BlockSpec((None,) + shape, lambda b, l: (l,) + (0,) * len(shape))

    act_spec = pl.BlockSpec((bt, S, E), lambda b, l: (b, 0, 0))
    lnf_spec = pl.BlockSpec((1, E), lambda b, l: (0, 0))

    return pl.pallas_call(
        functools.partial(gpt_blocks_kernel, num_heads=num_heads),
        out_shape=jax.ShapeDtypeStruct((B, S, E), jnp.float32),
        grid=(n_bt, L),
        in_specs=[
            act_spec,                                    # embeddings (read at layer 0)
            w_spec(1, E), w_spec(1, E),                  # ln1 w/b
            w_spec(E, 3 * E), w_spec(1, 3 * E),          # fused qkv w/b (scale pre-folded)
            w_spec(E, E), w_spec(1, E),                  # out-proj w/b
            w_spec(1, E), w_spec(1, E),                  # ln2 w/b
            w_spec(E, F), w_spec(1, F),                  # ffn w1/b1
            w_spec(F, E), w_spec(1, E),                  # ffn w2/b2
            lnf_spec, lnf_spec,                          # final LN w/b
        ],
        # layer-constant index map -> activations stay resident across the layer axis
        out_specs=act_spec,
        compiler_params=pltpu.CompilerParams(
            dimension_semantics=("parallel", "arbitrary"),
            vmem_limit_bytes=_VMEM_LIMIT),
    )(x, params['ln1w'], params['ln1b'], params['wqkv'], params['bqkv'],
      params['wo'], params['bo'], params['ln2w'], params['ln2b'],
      params['w1'], params['b1'], params['w2'], params['b2'],
      params['lnf_w'], params['lnf_b'])


def apply_lm_head(h, w_t, b, tile_v=VOCAB_TILE):
    B, S, E = h.shape
    Vp = w_t.shape[1]
    tile_v = min(tile_v, Vp)
    assert Vp % tile_v == 0
    return pl.pallas_call(
        lm_head_kernel,
        out_shape=jax.ShapeDtypeStruct((B, S, Vp), jnp.float32),
        grid=(Vp // tile_v,),
        in_specs=[
            pl.BlockSpec((B, S, E), lambda j: (0, 0, 0)),
            pl.BlockSpec((E, tile_v), lambda j: (0, j)),   # streamed bf16 (K,N)-layout tile
            pl.BlockSpec((1, tile_v), lambda j: (0, j)),
        ],
        out_specs=pl.BlockSpec((B, S, tile_v), lambda j: (0, 0, j)),  # lane-dense output
        compiler_params=pltpu.CompilerParams(
            dimension_semantics=("parallel",),
            vmem_limit_bytes=_VMEM_LIMIT),
    )(h, w_t, b)


# --------------------------------------------------------------------------
# Model (glue in plain JAX: embedding gather, parameter plumbing)
# --------------------------------------------------------------------------
def init_params(key, vocab_size, embed_dim, num_heads, num_layers, block_size, ff_mult=4):
    E, L = embed_dim, num_layers
    F = ff_mult * E
    Dh = E // num_heads
    scale = 1.0 / (Dh ** 0.5)
    Vp = _round_up(vocab_size, VOCAB_TILE)   # pad vocab so LM-head tiles are lane-dense
    keys = iter(jax.random.split(key, 32))
    bf16, f32 = jnp.bfloat16, jnp.float32

    def nrm(shape, std=0.02):
        return (jax.random.normal(next(keys), shape) * std).astype(f32)

    tok = jnp.zeros((Vp, E), f32).at[:vocab_size].set(nrm((vocab_size, E))).astype(bf16)
    lm_b = jnp.zeros((1, Vp), f32).at[:, :vocab_size].set(nrm((1, vocab_size)))

    # Fold the 1/sqrt(Dh) attention scale into the Q columns of the fused QKV projection
    # (weight AND bias): same forward math, one less (B,S,E) VPU multiply per layer.
    wqkv = nrm((L, E, 3 * E)).at[:, :, :E].multiply(scale)
    bqkv = nrm((L, 1, 3 * E)).at[:, :, :E].multiply(scale)

    return {
        'tok_emb': tok,                      # (Vp, E) bf16 tied embedding / LM-head weight
        'lm_w_t': tok.T,                     # (E, Vp) bf16 pre-transposed head weight (K,N)
        'lm_b': lm_b,                        # f32
        'pos_emb': nrm((block_size, E)),     # f32
        'ln1w': jnp.ones((L, 1, E), f32),
        'ln1b': jnp.zeros((L, 1, E), f32),
        'wqkv': wqkv.astype(bf16),
        'bqkv': bqkv,
        'wo': nrm((L, E, E)).astype(bf16),
        'bo': nrm((L, 1, E)),
        'ln2w': jnp.ones((L, 1, E), f32),
        'ln2b': jnp.zeros((L, 1, E), f32),
        'w1': nrm((L, E, F)).astype(bf16),
        'b1': nrm((L, 1, F)),
        'w2': nrm((L, F, E)).astype(bf16),
        'b2': nrm((L, 1, E)),
        'lnf_w': jnp.ones((1, E), f32),
        'lnf_b': jnp.zeros((1, E), f32),
    }


def smallgpt_forward(idx, params, num_heads, vocab_size):
    """task_type='language_modeling' forward -> (B, S, vocab) logits."""
    B, S = idx.shape
    # token/positional embedding gather stays in plain JAX (data-dependent row gather);
    # embedding dropout == identity (eval)
    x = jnp.take(params['tok_emb'], idx, axis=0).astype(jnp.float32) \
        + params['pos_emb'][:S][None]
    h = apply_blocks(x, params, num_heads)                 # includes the final LayerNorm
    logits = apply_lm_head(h, params['lm_w_t'], params['lm_b'])
    return logits[..., :vocab_size]         # drop the vocab padding columns


# Pure-JAX reference with identical math (same bf16 cast points, f32 LN/softmax).
def smallgpt_reference(idx, params, num_heads, vocab_size):
    bf16, f32 = jnp.bfloat16, jnp.float32
    x = jnp.take(params['tok_emb'], idx, axis=0).astype(f32) \
        + params['pos_emb'][:idx.shape[1]][None]
    B, S, E = x.shape
    H = num_heads
    Dh = E // H
    L = params['wqkv'].shape[0]
    rows = lax.broadcasted_iota(jnp.int32, (S, S), 0)
    cols = lax.broadcasted_iota(jnp.int32, (S, S), 1)
    causal = (cols <= rows)[None, None]
    for l in range(L):
        h = _layernorm(x, params['ln1w'][l], params['ln1b'][l])
        qkv = jnp.dot(h.reshape(B * S, E).astype(bf16), params['wqkv'][l],
                      preferred_element_type=f32) + params['bqkv'][l]
        qkv = qkv.reshape(B, S, 3 * E)
        q, k, v = qkv[..., :E], qkv[..., E:2 * E], qkv[..., 2 * E:]
        q = q.reshape(B, S, H, Dh).transpose(0, 2, 1, 3)
        k = k.reshape(B, S, H, Dh).transpose(0, 2, 1, 3)
        v = v.reshape(B, S, H, Dh).transpose(0, 2, 1, 3)
        s = jnp.einsum('bhqd,bhkd->bhqk', q.astype(bf16), k.astype(bf16),
                       preferred_element_type=f32)
        s = jnp.where(causal, s, NEG_INF)
        s = s - s.max(-1, keepdims=True)
        p = jnp.exp(s)
        p = p / p.sum(-1, keepdims=True)
        ctx = jnp.einsum('bhqk,bhkd->bhqd', p.astype(bf16), v.astype(bf16),
                         preferred_element_type=f32)
        ctx = ctx.transpose(0, 2, 1, 3).reshape(B * S, E)
        attn = jnp.dot(ctx.astype(bf16), params['wo'][l],
                       preferred_element_type=f32) + params['bo'][l]
        x = x + attn.reshape(B, S, E)
        h2 = _layernorm(x, params['ln2w'][l], params['ln2b'][l]).reshape(B * S, E)
        ff = jnp.dot(h2.astype(bf16), params['w1'][l],
                     preferred_element_type=f32) + params['b1'][l]
        ff = jnp.maximum(ff, 0.0)
        ff = jnp.dot(ff.astype(bf16), params['w2'][l],
                     preferred_element_type=f32) + params['b2'][l]
        x = x + ff.reshape(B, S, E)
    h = _layernorm(x, params['lnf_w'], params['lnf_b'])
    logits = jnp.dot(h.reshape(B * S, E).astype(bf16), params['lm_w_t'],
                     preferred_element_type=f32) + params['lm_b']
    return logits.reshape(B, S, -1)[..., :vocab_size]


if __name__ == "__main__":
    VOCAB, EMBED, HEADS, LAYERS, BLOCK = 64, 32, 4, 2, 8
    BATCH, SEQ = 2, 8

    key = jax.random.PRNGKey(0)
    pkey, ikey = jax.random.split(key)
    params = init_params(pkey, VOCAB, EMBED, HEADS, LAYERS, BLOCK)
    idx = jax.random.randint(ikey, (BATCH, SEQ), 0, VOCAB, dtype=jnp.int32)

    logits = jax.block_until_ready(smallgpt_forward(idx, params, HEADS, VOCAB))
    ref = jax.block_until_ready(smallgpt_reference(idx, params, HEADS, VOCAB))

    assert logits.shape == (BATCH, SEQ, VOCAB)
    # tolerance covers the EUP approximate reciprocal in the softmax denominator and
    # MXU vs XLA f32-accumulation-order differences (all matmul operands are bf16 in both).
    assert jnp.allclose(logits, ref, rtol=1e-2, atol=1e-2), "kernel/reference mismatch"
    print("KERNEL_OK")
</pallas_src>

<mosaic_0001>
module attributes {stable_mosaic.version = 11 : i64} {
  func.func @gpt_blocks_kernel(%arg0: i32, %arg1: i32, %arg2: memref<1x8x32xf32, #tpu.memory_space<vmem>>, %arg3: memref<1x1x32xf32, #tpu.memory_space<vmem>>, %arg4: memref<1x1x32xf32, #tpu.memory_space<vmem>>, %arg5: memref<1x32x96xbf16, #tpu.memory_space<vmem>>, %arg6: memref<1x1x96xf32, #tpu.memory_space<vmem>>, %arg7: memref<1x32x32xbf16, #tpu.memory_space<vmem>>, %arg8: memref<1x1x32xf32, #tpu.memory_space<vmem>>, %arg9: memref<1x1x32xf32, #tpu.memory_space<vmem>>, %arg10: memref<1x1x32xf32, #tpu.memory_space<vmem>>, %arg11: memref<1x32x128xbf16, #tpu.memory_space<vmem>>, %arg12: memref<1x1x128xf32, #tpu.memory_space<vmem>>, %arg13: memref<1x128x32xbf16, #tpu.memory_space<vmem>>, %arg14: memref<1x1x32xf32, #tpu.memory_space<vmem>>, %arg15: memref<1x32xf32, #tpu.memory_space<vmem>>, %arg16: memref<1x32xf32, #tpu.memory_space<vmem>>, %arg17: memref<1x8x32xf32, #tpu.memory_space<vmem>>) attributes {dimension_semantics = [#tpu.dimension_semantics<parallel>, #tpu.dimension_semantics<arbitrary>], iteration_bounds = array<i64: 2, 2>, scalar_prefetch = 0 : i64, scratch_operands = 0 : i64, tpu.core_type = #tpu.core_type<tc>, window_params = [{transform_indices = @transform_0, window_bounds = array<i64: 1, 8, 32>}, {transform_indices = @transform_1, window_bounds = array<i64: 1, 1, 32>}, {transform_indices = @transform_2, window_bounds = array<i64: 1, 1, 32>}, {transform_indices = @transform_3, window_bounds = array<i64: 1, 32, 96>}, {transform_indices = @transform_4, window_bounds = array<i64: 1, 1, 96>}, {transform_indices = @transform_5, window_bounds = array<i64: 1, 32, 32>}, {transform_indices = @transform_6, window_bounds = array<i64: 1, 1, 32>}, {transform_indices = @transform_7, window_bounds = array<i64: 1, 1, 32>}, {transform_indices = @transform_8, window_bounds = array<i64: 1, 1, 32>}, {transform_indices = @transform_9, window_bounds = array<i64: 1, 32, 128>}, {transform_indices = @transform_10, window_bounds = array<i64: 1, 1, 128>}, {transform_indices = @transform_11, window_bounds = array<i64: 1, 128, 32>}, {transform_indices = @transform_12, window_bounds = array<i64: 1, 1, 32>}, {pipeline_mode = #tpu.pipeline_mode<synchronous>, transform_indices = @transform_13, window_bounds = array<i64: 1, 32>}, {pipeline_mode = #tpu.pipeline_mode<synchronous>, transform_indices = @transform_14, window_bounds = array<i64: 1, 32>}, {transform_indices = @transform_15, window_bounds = array<i64: 1, 8, 32>}]} {
    %c0_i32 = arith.constant 0 : i32
    %0 = arith.cmpi eq, %arg1, %c0_i32 : i32
    %1 = arith.extui %0 : i1 to i32
    %c0_i32_0 = arith.constant 0 : i32
    %2 = arith.cmpi ne, %1, %c0_i32_0 : i32
    scf.if %2 {
      %c0_76 = arith.constant 0 : index
      %c0_77 = arith.constant 0 : index
      %c0_78 = arith.constant 0 : index
      %200 = vector.load %arg2[%c0_76, %c0_77, %c0_78] : memref<1x8x32xf32, #tpu.memory_space<vmem>>, vector<1x8x32xf32>
      %c0_79 = arith.constant 0 : index
      %c0_80 = arith.constant 0 : index
      %c0_81 = arith.constant 0 : index
      %201 = vector.load %arg17[%c0_79, %c0_80, %c0_81] : memref<1x8x32xf32, #tpu.memory_space<vmem>>, vector<1x8x32xf32>
      tpu.vector_store %arg17[%c0_79, %c0_80, %c0_81], %200 {strides = array<i32>} : memref<1x8x32xf32, #tpu.memory_space<vmem>>, vector<1x8x32xf32>,
    } else {
    }
    %c0 = arith.constant 0 : index
    %c0_1 = arith.constant 0 : index
    %c0_2 = arith.constant 0 : index
    %3 = vector.load %arg17[%c0, %c0_1, %c0_2] : memref<1x8x32xf32, #tpu.memory_space<vmem>>, vector<1x8x32xf32>
    %c0_3 = arith.constant 0 : index
    %c0_4 = arith.constant 0 : index
    %c0_5 = arith.constant 0 : index
    %4 = vector.load %arg3[%c0_3, %c0_4, %c0_5] : memref<1x1x32xf32, #tpu.memory_space<vmem>>, vector<1x1x32xf32>
    %5 = vector.shape_cast %4 : vector<1x1x32xf32> to vector<1x32xf32>
    %c0_6 = arith.constant 0 : index
    %c0_7 = arith.constant 0 : index
    %c0_8 = arith.constant 0 : index
    %6 = vector.load %arg4[%c0_6, %c0_7, %c0_8] : memref<1x1x32xf32, #tpu.memory_space<vmem>>, vector<1x1x32xf32>
    %7 = vector.shape_cast %6 : vector<1x1x32xf32> to vector<1x32xf32>
    %cst = arith.constant dense<0.000000e+00> : vector<1x8xf32>
    %8 = vector.multi_reduction <add>, %3, %cst [2] : vector<1x8x32xf32> to vector<1x8xf32>
    %9 = vector.shape_cast %8 : vector<1x8xf32> to vector<1x8x1xf32>
    %cst_9 = arith.constant 3.200000e+01 : f32
    %10 = vector.broadcast %cst_9 : f32 to vector<1x8x1xf32>
    %11 = arith.divf %9, %10 : vector<1x8x1xf32>
    %12 = vector.broadcast %11 : vector<1x8x1xf32> to vector<1x8x32xf32>
    %13 = arith.subf %3, %12 : vector<1x8x32xf32>
    %14 = arith.mulf %13, %13 : vector<1x8x32xf32>
    %cst_10 = arith.constant dense<0.000000e+00> : vector<1x8xf32>
    %15 = vector.multi_reduction <add>, %14, %cst_10 [2] : vector<1x8x32xf32> to vector<1x8xf32>
    %16 = vector.shape_cast %15 : vector<1x8xf32> to vector<1x8x1xf32>
    %cst_11 = arith.constant 3.200000e+01 : f32
    %17 = vector.broadcast %cst_11 : f32 to vector<1x8x1xf32>
    %18 = arith.divf %16, %17 : vector<1x8x1xf32>
    %19 = vector.broadcast %11 : vector<1x8x1xf32> to vector<1x8x32xf32>
    %20 = arith.subf %3, %19 : vector<1x8x32xf32>
    %cst_12 = arith.constant 9.99999974E-6 : f32
    %21 = vector.broadcast %cst_12 : f32 to vector<1x8x1xf32>
    %22 = arith.addf %18, %21 : vector<1x8x1xf32>
    %23 = math.rsqrt %22 : vector<1x8x1xf32>
    %24 = vector.broadcast %23 : vector<1x8x1xf32> to vector<1x8x32xf32>
    %25 = arith.mulf %20, %24 : vector<1x8x32xf32>
    %26 = vector.shape_cast %5 : vector<1x32xf32> to vector<1x1x32xf32>
    %27 = vector.broadcast %26 : vector<1x1x32xf32> to vector<1x8x32xf32>
    %28 = arith.mulf %25, %27 : vector<1x8x32xf32>
    %29 = vector.shape_cast %7 : vector<1x32xf32> to vector<1x1x32xf32>
    %30 = vector.broadcast %29 : vector<1x1x32xf32> to vector<1x8x32xf32>
    %31 = arith.addf %28, %30 : vector<1x8x32xf32>
    %32 = vector.shape_cast %31 : vector<1x8x32xf32> to vector<8x32xf32>
    %33 = arith.truncf %32 : vector<8x32xf32> to vector<8x32xbf16>
    %c0_13 = arith.constant 0 : index
    %c0_14 = arith.constant 0 : index
    %c0_15 = arith.constant 0 : index
    %34 = vector.load %arg5[%c0_13, %c0_14, %c0_15] : memref<1x32x96xbf16, #tpu.memory_space<vmem>>, vector<1x32x96xbf16>
    %35 = vector.shape_cast %34 : vector<1x32x96xbf16> to vector<32x96xbf16>
    %cst_16 = arith.constant dense<0.000000e+00> : vector<8x96xf32>
    %36 = tpu.matmul %33, %35, %cst_16 {dimension_numbers = #tpu.dot_dimension_numbers<[1], [0], [0], [1], [0, 0, 1, 1], [], []>} : vector<8x32xbf16>, vector<32x96xbf16>, vector<8x96xf32> -> vector<8x96xf32>
    %c0_17 = arith.constant 0 : index
    %c0_18 = arith.constant 0 : index
    %c0_19 = arith.constant 0 : index
    %37 = vector.load %arg6[%c0_17, %c0_18, %c0_19] : memref<1x1x96xf32, #tpu.memory_space<vmem>>, vector<1x1x96xf32>
    %38 = vector.shape_cast %37 : vector<1x1x96xf32> to vector<1x96xf32>
    %39 = vector.broadcast %38 : vector<1x96xf32> to vector<8x96xf32>
    %40 = arith.addf %36, %39 : vector<8x96xf32>
    %41 = vector.shape_cast %40 : vector<8x96xf32> to vector<1x8x96xf32>
    %42 = vector.extract_strided_slice %41 {offsets = [0, 0, 0], sizes = [1, 8, 32], strides = [1, 1, 1]} : vector<1x8x96xf32> to vector<1x8x32xf32>
    %43 = vector.extract_strided_slice %41 {offsets = [0, 0, 32], sizes = [1, 8, 32], strides = [1, 1, 1]} : vector<1x8x96xf32> to vector<1x8x32xf32>
    %44 = vector.extract_strided_slice %41 {offsets = [0, 0, 64], sizes = [1, 8, 32], strides = [1, 1, 1]} : vector<1x8x96xf32> to vector<1x8x32xf32>
    %45 = tpu.iota {dimensions = array<i32: 0>} : vector<8x8xi32>
    %46 = tpu.iota {dimensions = array<i32: 1>} : vector<8x8xi32>
    %47 = arith.cmpi sle, %46, %45 : vector<8x8xi32>
    %48 = vector.shape_cast %47 : vector<8x8xi1> to vector<1x8x8xi1>
    %49 = vector.extract_strided_slice %42 {offsets = [0, 0, 0], sizes = [1, 8, 8], strides = [1, 1, 1]} : vector<1x8x32xf32> to vector<1x8x8xf32>
    %50 = arith.truncf %49 : vector<1x8x8xf32> to vector<1x8x8xbf16>
    %51 = vector.extract_strided_slice %43 {offsets = [0, 0, 0], sizes = [1, 8, 8], strides = [1, 1, 1]} : vector<1x8x32xf32> to vector<1x8x8xf32>
    %52 = arith.truncf %51 : vector<1x8x8xf32> to vector<1x8x8xbf16>
    "tpu.trace_start"() <{level = 10 : i32, message = "bqd,bkd->bqk"}> : () -> ()
    %cst_20 = arith.constant dense<0.000000e+00> : vector<1x8x8xf32>
    %53 = tpu.matmul %50, %52, %cst_20 {dimension_numbers = #tpu.dot_dimension_numbers<[2], [2], [1], [1], [0, 0, 0, 1, 1, 1], [0], [0]>} : vector<1x8x8xbf16>, vector<1x8x8xbf16>, vector<1x8x8xf32> -> vector<1x8x8xf32>
    %cst_21 = arith.constant -1.000000e+30 : f32
    "tpu.trace_stop"() : () -> ()
    %54 = vector.broadcast %cst_21 : f32 to vector<1x8x8xf32>
    %55 = arith.select %48, %53, %54 : vector<1x8x8xi1>, vector<1x8x8xf32>
    %cst_22 = arith.constant dense<0xFF800000> : vector<1x8xf32>
    %56 = vector.multi_reduction <maximumf>, %55, %cst_22 [2] : vector<1x8x8xf32> to vector<1x8xf32>
    %57 = vector.shape_cast %56 : vector<1x8xf32> to vector<1x8x1xf32>
    %58 = vector.broadcast %57 : vector<1x8x1xf32> to vector<1x8x8xf32>
    %59 = arith.subf %55, %58 : vector<1x8x8xf32>
    %60 = math.exp %59 : vector<1x8x8xf32>
    %cst_23 = arith.constant dense<0.000000e+00> : vector<1x8xf32>
    %61 = vector.multi_reduction <add>, %60, %cst_23 [2] : vector<1x8x8xf32> to vector<1x8xf32>
    %62 = vector.shape_cast %61 : vector<1x8xf32> to vector<1x8x1xf32>
    %63 = tpu.reciprocal %62 {approx = true} : vector<1x8x1xf32> -> vector<1x8x1xf32>
    %64 = vector.broadcast %63 : vector<1x8x1xf32> to vector<1x8x8xf32>
    %65 = arith.mulf %60, %64 : vector<1x8x8xf32>
    %66 = arith.truncf %65 : vector<1x8x8xf32> to vector<1x8x8xbf16>
    %67 = vector.extract_strided_slice %44 {offsets = [0, 0, 0], sizes = [1, 8, 8], strides = [1, 1, 1]} : vector<1x8x32xf32> to vector<1x8x8xf32>
    %68 = arith.truncf %67 : vector<1x8x8xf32> to vector<1x8x8xbf16>
    "tpu.trace_start"() <{level = 10 : i32, message = "bqk,bkd->bqd"}> : () -> ()
    %cst_24 = arith.constant dense<0.000000e+00> : vector<1x8x8xf32>
    %69 = tpu.matmul %66, %68, %cst_24 {dimension_numbers = #tpu.dot_dimension_numbers<[2], [1], [1], [2], [0, 0, 0, 1, 1, 2], [0], [0]>} : vector<1x8x8xbf16>, vector<1x8x8xbf16>, vector<1x8x8xf32> -> vector<1x8x8xf32>
    "tpu.trace_stop"() : () -> ()
    %70 = vector.extract_strided_slice %42 {offsets = [0, 0, 8], sizes = [1, 8, 8], strides = [1, 1, 1]} : vector<1x8x32xf32> to vector<1x8x8xf32>
    %71 = arith.truncf %70 : vector<1x8x8xf32> to vector<1x8x8xbf16>
    %72 = vector.extract_strided_slice %43 {offsets = [0, 0, 8], sizes = [1, 8, 8], strides = [1, 1, 1]} : vector<1x8x32xf32> to vector<1x8x8xf32>
    %73 = arith.truncf %72 : vector<1x8x8xf32> to vector<1x8x8xbf16>
    "tpu.trace_start"() <{level = 10 : i32, message = "bqd,bkd->bqk"}> : () -> ()
    %cst_25 = arith.constant dense<0.000000e+00> : vector<1x8x8xf32>
    %74 = tpu.matmul %71, %73, %cst_25 {dimension_numbers = #tpu.dot_dimension_numbers<[2], [2], [1], [1], [0, 0, 0, 1, 1, 1], [0], [0]>} : vector<1x8x8xbf16>, vector<1x8x8xbf16>, vector<1x8x8xf32> -> vector<1x8x8xf32>
    %cst_26 = arith.constant -1.000000e+30 : f32
    "tpu.trace_stop"() : () -> ()
    %75 = vector.broadcast %cst_26 : f32 to vector<1x8x8xf32>
    %76 = arith.select %48, %74, %75 : vector<1x8x8xi1>, vector<1x8x8xf32>
    %cst_27 = arith.constant dense<0xFF800000> : vector<1x8xf32>
    %77 = vector.multi_reduction <maximumf>, %76, %cst_27 [2] : vector<1x8x8xf32> to vector<1x8xf32>
    %78 = vector.shape_cast %77 : vector<1x8xf32> to vector<1x8x1xf32>
    %79 = vector.broadcast %78 : vector<1x8x1xf32> to vector<1x8x8xf32>
    %80 = arith.subf %76, %79 : vector<1x8x8xf32>
    %81 = math.exp %80 : vector<1x8x8xf32>
    %cst_28 = arith.constant dense<0.000000e+00> : vector<1x8xf32>
    %82 = vector.multi_reduction <add>, %81, %cst_28 [2] : vector<1x8x8xf32> to vector<1x8xf32>
    %83 = vector.shape_cast %82 : vector<1x8xf32> to vector<1x8x1xf32>
    %84 = tpu.reciprocal %83 {approx = true} : vector<1x8x1xf32> -> vector<1x8x1xf32>
    %85 = vector.broadcast %84 : vector<1x8x1xf32> to vector<1x8x8xf32>
    %86 = arith.mulf %81, %85 : vector<1x8x8xf32>
    %87 = arith.truncf %86 : vector<1x8x8xf32> to vector<1x8x8xbf16>
    %88 = vector.extract_strided_slice %44 {offsets = [0, 0, 8], sizes = [1, 8, 8], strides = [1, 1, 1]} : vector<1x8x32xf32> to vector<1x8x8xf32>
    %89 = arith.truncf %88 : vector<1x8x8xf32> to vector<1x8x8xbf16>
    "tpu.trace_start"() <{level = 10 : i32, message = "bqk,bkd->bqd"}> : () -> ()
    %cst_29 = arith.constant dense<0.000000e+00> : vector<1x8x8xf32>
    %90 = tpu.matmul %87, %89, %cst_29 {dimension_numbers = #tpu.dot_dimension_numbers<[2], [1], [1], [2], [0, 0, 0, 1, 1, 2], [0], [0]>} : vector<1x8x8xbf16>, vector<1x8x8xbf16>, vector<1x8x8xf32> -> vector<1x8x8xf32>
    "tpu.trace_stop"() : () -> ()
    %91 = vector.extract_strided_slice %42 {offsets = [0, 0, 16], sizes = [1, 8, 8], strides = [1, 1, 1]} : vector<1x8x32xf32> to vector<1x8x8xf32>
    %92 = arith.truncf %91 : vector<1x8x8xf32> to vector<1x8x8xbf16>
    %93 = vector.extract_strided_slice %43 {offsets = [0, 0, 16], sizes = [1, 8, 8], strides = [1, 1, 1]} : vector<1x8x32xf32> to vector<1x8x8xf32>
    %94 = arith.truncf %93 : vector<1x8x8xf32> to vector<1x8x8xbf16>
    "tpu.trace_start"() <{level = 10 : i32, message = "bqd,bkd->bqk"}> : () -> ()
    %cst_30 = arith.constant dense<0.000000e+00> : vector<1x8x8xf32>
    %95 = tpu.matmul %92, %94, %cst_30 {dimension_numbers = #tpu.dot_dimension_numbers<[2], [2], [1], [1], [0, 0, 0, 1, 1, 1], [0], [0]>} : vector<1x8x8xbf16>, vector<1x8x8xbf16>, vector<1x8x8xf32> -> vector<1x8x8xf32>
    %cst_31 = arith.constant -1.000000e+30 : f32
    "tpu.trace_stop"() : () -> ()
    %96 = vector.broadcast %cst_31 : f32 to vector<1x8x8xf32>
    %97 = arith.select %48, %95, %96 : vector<1x8x8xi1>, vector<1x8x8xf32>
    %cst_32 = arith.constant dense<0xFF800000> : vector<1x8xf32>
    %98 = vector.multi_reduction <maximumf>, %97, %cst_32 [2] : vector<1x8x8xf32> to vector<1x8xf32>
    %99 = vector.shape_cast %98 : vector<1x8xf32> to vector<1x8x1xf32>
    %100 = vector.broadcast %99 : vector<1x8x1xf32> to vector<1x8x8xf32>
    %101 = arith.subf %97, %100 : vector<1x8x8xf32>
    %102 = math.exp %101 : vector<1x8x8xf32>
    %cst_33 = arith.constant dense<0.000000e+00> : vector<1x8xf32>
    %103 = vector.multi_reduction <add>, %102, %cst_33 [2] : vector<1x8x8xf32> to vector<1x8xf32>
    %104 = vector.shape_cast %103 : vector<1x8xf32> to vector<1x8x1xf32>
    %105 = tpu.reciprocal %104 {approx = true} : vector<1x8x1xf32> -> vector<1x8x1xf32>
    %106 = vector.broadcast %105 : vector<1x8x1xf32> to vector<1x8x8xf32>
    %107 = arith.mulf %102, %106 : vector<1x8x8xf32>
    %108 = arith.truncf %107 : vector<1x8x8xf32> to vector<1x8x8xbf16>
    %109 = vector.extract_strided_slice %44 {offsets = [0, 0, 16], sizes = [1, 8, 8], strides = [1, 1, 1]} : vector<1x8x32xf32> to vector<1x8x8xf32>
    %110 = arith.truncf %109 : vector<1x8x8xf32> to vector<1x8x8xbf16>
    "tpu.trace_start"() <{level = 10 : i32, message = "bqk,bkd->bqd"}> : () -> ()
    %cst_34 = arith.constant dense<0.000000e+00> : vector<1x8x8xf32>
    %111 = tpu.matmul %108, %110, %cst_34 {dimension_numbers = #tpu.dot_dimension_numbers<[2], [1], [1], [2], [0, 0, 0, 1, 1, 2], [0], [0]>} : vector<1x8x8xbf16>, vector<1x8x8xbf16>, vector<1x8x8xf32> -> vector<1x8x8xf32>
    "tpu.trace_stop"() : () -> ()
    %112 = vector.extract_strided_slice %42 {offsets = [0, 0, 24], sizes = [1, 8, 8], strides = [1, 1, 1]} : vector<1x8x32xf32> to vector<1x8x8xf32>
    %113 = arith.truncf %112 : vector<1x8x8xf32> to vector<1x8x8xbf16>
    %114 = vector.extract_strided_slice %43 {offsets = [0, 0, 24], sizes = [1, 8, 8], strides = [1, 1, 1]} : vector<1x8x32xf32> to vector<1x8x8xf32>
    %115 = arith.truncf %114 : vector<1x8x8xf32> to vector<1x8x8xbf16>
    "tpu.trace_start"() <{level = 10 : i32, message = "bqd,bkd->bqk"}> : () -> ()
    %cst_35 = arith.constant dense<0.000000e+00> : vector<1x8x8xf32>
    %116 = tpu.matmul %113, %115, %cst_35 {dimension_numbers = #tpu.dot_dimension_numbers<[2], [2], [1], [1], [0, 0, 0, 1, 1, 1], [0], [0]>} : vector<1x8x8xbf16>, vector<1x8x8xbf16>, vector<1x8x8xf32> -> vector<1x8x8xf32>
    %cst_36 = arith.constant -1.000000e+30 : f32
    "tpu.trace_stop"() : () -> ()
    %117 = vector.broadcast %cst_36 : f32 to vector<1x8x8xf32>
    %118 = arith.select %48, %116, %117 : vector<1x8x8xi1>, vector<1x8x8xf32>
    %cst_37 = arith.constant dense<0xFF800000> : vector<1x8xf32>
    %119 = vector.multi_reduction <maximumf>, %118, %cst_37 [2] : vector<1x8x8xf32> to vector<1x8xf32>
    %120 = vector.shape_cast %119 : vector<1x8xf32> to vector<1x8x1xf32>
    %121 = vector.broadcast %120 : vector<1x8x1xf32> to vector<1x8x8xf32>
    %122 = arith.subf %118, %121 : vector<1x8x8xf32>
    %123 = math.exp %122 : vector<1x8x8xf32>
    %cst_38 = arith.constant dense<0.000000e+00> : vector<1x8xf32>
    %124 = vector.multi_reduction <add>, %123, %cst_38 [2] : vector<1x8x8xf32> to vector<1x8xf32>
    %125 = vector.shape_cast %124 : vector<1x8xf32> to vector<1x8x1xf32>
    %126 = tpu.reciprocal %125 {approx = true} : vector<1x8x1xf32> -> vector<1x8x1xf32>
    %127 = vector.broadcast %126 : vector<1x8x1xf32> to vector<1x8x8xf32>
    %128 = arith.mulf %123, %127 : vector<1x8x8xf32>
    %129 = arith.truncf %128 : vector<1x8x8xf32> to vector<1x8x8xbf16>
    %130 = vector.extract_strided_slice %44 {offsets = [0, 0, 24], sizes = [1, 8, 8], strides = [1, 1, 1]} : vector<1x8x32xf32> to vector<1x8x8xf32>
    %131 = arith.truncf %130 : vector<1x8x8xf32> to vector<1x8x8xbf16>
    "tpu.trace_start"() <{level = 10 : i32, message = "bqk,bkd->bqd"}> : () -> ()
    %cst_39 = arith.constant dense<0.000000e+00> : vector<1x8x8xf32>
    %132 = tpu.matmul %129, %131, %cst_39 {dimension_numbers = #tpu.dot_dimension_numbers<[2], [1], [1], [2], [0, 0, 0, 1, 1, 2], [0], [0]>} : vector<1x8x8xbf16>, vector<1x8x8xbf16>, vector<1x8x8xf32> -> vector<1x8x8xf32>
    "tpu.trace_stop"() : () -> ()
    %133 = tpu.concatenate %69, %90, %111, %132 in 2 : vector<1x8x8xf32>, vector<1x8x8xf32>, vector<1x8x8xf32>, vector<1x8x8xf32> -> vector<1x8x32xf32>
    %134 = vector.shape_cast %133 : vector<1x8x32xf32> to vector<8x32xf32>
    %135 = arith.truncf %134 : vector<8x32xf32> to vector<8x32xbf16>
    %c0_40 = arith.constant 0 : index
    %c0_41 = arith.constant 0 : index
    %c0_42 = arith.constant 0 : index
    %136 = vector.load %arg7[%c0_40, %c0_41, %c0_42] : memref<1x32x32xbf16, #tpu.memory_space<vmem>>, vector<1x32x32xbf16>
    %137 = vector.shape_cast %136 : vector<1x32x32xbf16> to vector<32x32xbf16>
    %cst_43 = arith.constant dense<0.000000e+00> : vector<8x32xf32>
    %138 = tpu.matmul %135, %137, %cst_43 {dimension_numbers = #tpu.dot_dimension_numbers<[1], [0], [0], [1], [0, 0, 1, 1], [], []>} : vector<8x32xbf16>, vector<32x32xbf16>, vector<8x32xf32> -> vector<8x32xf32>
    %c0_44 = arith.constant 0 : index
    %c0_45 = arith.constant 0 : index
    %c0_46 = arith.constant 0 : index
    %139 = vector.load %arg8[%c0_44, %c0_45, %c0_46] : memref<1x1x32xf32, #tpu.memory_space<vmem>>, vector<1x1x32xf32>
    %140 = vector.shape_cast %139 : vector<1x1x32xf32> to vector<1x32xf32>
    %141 = vector.broadcast %140 : vector<1x32xf32> to vector<8x32xf32>
    %142 = arith.addf %138, %141 : vector<8x32xf32>
    %143 = vector.shape_cast %142 : vector<8x32xf32> to vector<1x8x32xf32>
    %144 = arith.addf %3, %143 : vector<1x8x32xf32>
    %c0_47 = arith.constant 0 : index
    %c0_48 = arith.constant 0 : index
    %c0_49 = arith.constant 0 : index
    %145 = vector.load %arg9[%c0_47, %c0_48, %c0_49] : memref<1x1x32xf32, #tpu.memory_space<vmem>>, vector<1x1x32xf32>
    %146 = vector.shape_cast %145 : vector<1x1x32xf32> to vector<1x32xf32>
    %c0_50 = arith.constant 0 : index
    %c0_51 = arith.constant 0 : index
    %c0_52 = arith.constant 0 : index
    %147 = vector.load %arg10[%c0_50, %c0_51, %c0_52] : memref<1x1x32xf32, #tpu.memory_space<vmem>>, vector<1x1x32xf32>
    %148 = vector.shape_cast %147 : vector<1x1x32xf32> to vector<1x32xf32>
    %cst_53 = arith.constant dense<0.000000e+00> : vector<1x8xf32>
    %149 = vector.multi_reduction <add>, %144, %cst_53 [2] : vector<1x8x32xf32> to vector<1x8xf32>
    %150 = vector.shape_cast %149 : vector<1x8xf32> to vector<1x8x1xf32>
    %cst_54 = arith.constant 3.200000e+01 : f32
    %151 = vector.broadcast %cst_54 : f32 to vector<1x8x1xf32>
    %152 = arith.divf %150, %151 : vector<1x8x1xf32>
    %153 = vector.broadcast %152 : vector<1x8x1xf32> to vector<1x8x32xf32>
    %154 = arith.subf %144, %153 : vector<1x8x32xf32>
    %155 = arith.mulf %154, %154 : vector<1x8x32xf32>
    %cst_55 = arith.constant dense<0.000000e+00> : vector<1x8xf32>
    %156 = vector.multi_reduction <add>, %155, %cst_55 [2] : vector<1x8x32xf32> to vector<1x8xf32>
    %157 = vector.shape_cast %156 : vector<1x8xf32> to vector<1x8x1xf32>
    %cst_56 = arith.constant 3.200000e+01 : f32
    %158 = vector.broadcast %cst_56 : f32 to vector<1x8x1xf32>
    %159 = arith.divf %157, %158 : vector<1x8x1xf32>
    %160 = vector.broadcast %152 : vector<1x8x1xf32> to vector<1x8x32xf32>
    %161 = arith.subf %144, %160 : vector<1x8x32xf32>
    %cst_57 = arith.constant 9.99999974E-6 : f32
    %162 = vector.broadcast %cst_57 : f32 to vector<1x8x1xf32>
    %163 = arith.addf %159, %162 : vector<1x8x1xf32>
    %164 = math.rsqrt %163 : vector<1x8x1xf32>
    %165 = vector.broadcast %164 : vector<1x8x1xf32> to vector<1x8x32xf32>
    %166 = arith.mulf %161, %165 : vector<1x8x32xf32>
    %167 = vector.shape_cast %146 : vector<1x32xf32> to vector<1x1x32xf32>
    %168 = vector.broadcast %167 : vector<1x1x32xf32> to vector<1x8x32xf32>
    %169 = arith.mulf %166, %168 : vector<1x8x32xf32>
    %170 = vector.shape_cast %148 : vector<1x32xf32> to vector<1x1x32xf32>
    %171 = vector.broadcast %170 : vector<1x1x32xf32> to vector<1x8x32xf32>
    %172 = arith.addf %169, %171 : vector<1x8x32xf32>
    %173 = vector.shape_cast %172 : vector<1x8x32xf32> to vector<8x32xf32>
    %174 = arith.truncf %173 : vector<8x32xf32> to vector<8x32xbf16>
    %c0_58 = arith.constant 0 : index
    %c0_59 = arith.constant 0 : index
    %c0_60 = arith.constant 0 : index
    %175 = vector.load %arg11[%c0_58, %c0_59, %c0_60] : memref<1x32x128xbf16, #tpu.memory_space<vmem>>, vector<1x32x128xbf16>
    %176 = vector.shape_cast %175 : vector<1x32x128xbf16> to vector<32x128xbf16>
    %cst_61 = arith.constant dense<0.000000e+00> : vector<8x128xf32>
    %177 = tpu.matmul %174, %176, %cst_61 {dimension_numbers = #tpu.dot_dimension_numbers<[1], [0], [0], [1], [0, 0, 1, 1], [], []>} : vector<8x32xbf16>, vector<32x128xbf16>, vector<8x128xf32> -> vector<8x128xf32>
    %c0_62 = arith.constant 0 : index
    %c0_63 = arith.constant 0 : index
    %c0_64 = arith.constant 0 : index
    %178 = vector.load %arg12[%c0_62, %c0_63, %c0_64] : memref<1x1x128xf32, #tpu.memory_space<vmem>>, vector<1x1x128xf32>
    %179 = vector.shape_cast %178 : vector<1x1x128xf32> to vector<1x128xf32>
    %180 = vector.broadcast %179 : vector<1x128xf32> to vector<8x128xf32>
    %181 = arith.addf %177, %180 : vector<8x128xf32>
    %cst_65 = arith.constant 0.000000e+00 : f32
    %182 = vector.broadcast %cst_65 : f32 to vector<8x128xf32>
    %183 = arith.maximumf %181, %182 : vector<8x128xf32>
    %184 = arith.truncf %183 : vector<8x128xf32> to vector<8x128xbf16>
    %c0_66 = arith.constant 0 : index
    %c0_67 = arith.constant 0 : index
    %c0_68 = arith.constant 0 : index
    %185 = vector.load %arg13[%c0_66, %c0_67, %c0_68] : memref<1x128x32xbf16, #tpu.memory_space<vmem>>, vector<1x128x32xbf16>
    %186 = vector.shape_cast %185 : vector<1x128x32xbf16> to vector<128x32xbf16>
    %cst_69 = arith.constant dense<0.000000e+00> : vector<8x32xf32>
    %187 = tpu.matmul %184, %186, %cst_69 {dimension_numbers = #tpu.dot_dimension_numbers<[1], [0], [0], [1], [0, 0, 1, 1], [], []>} : vector<8x128xbf16>, vector<128x32xbf16>, vector<8x32xf32> -> vector<8x32xf32>
    %c0_70 = arith.constant 0 : index
    %c0_71 = arith.constant 0 : index
    %c0_72 = arith.constant 0 : index
    %188 = vector.load %arg14[%c0_70, %c0_71, %c0_72] : memref<1x1x32xf32, #tpu.memory_space<vmem>>, vector<1x1x32xf32>
    %189 = vector.shape_cast %188 : vector<1x1x32xf32> to vector<1x32xf32>
    %190 = vector.broadcast %189 : vector<1x32xf32> to vector<8x32xf32>
    %191 = arith.addf %187, %190 : vector<8x32xf32>
    %192 = vector.shape_cast %191 : vector<8x32xf32> to vector<1x8x32xf32>
    %193 = arith.addf %144, %192 : vector<1x8x32xf32>
    %c1_i32 = arith.constant 1 : i32
    %194 = arith.cmpi slt, %arg1, %c1_i32 : i32
    %195 = arith.extui %194 : i1 to i32
    %c0_i32_73 = arith.constant 0 : i32
    %196 = arith.cmpi ne, %195, %c0_i32_73 : i32
    scf.if %196 {
      %c0_76 = arith.constant 0 : index
      %c0_77 = arith.constant 0 : index
      %c0_78 = arith.constant 0 : index
      %200 = vector.load %arg17[%c0_76, %c0_77, %c0_78] : memref<1x8x32xf32, #tpu.memory_space<vmem>>, vector<1x8x32xf32>
      tpu.vector_store %arg17[%c0_76, %c0_77, %c0_78], %193 {strides = array<i32>} : memref<1x8x32xf32, #tpu.memory_space<vmem>>, vector<1x8x32xf32>,
    } else {
    }
    %c1_i32_74 = arith.constant 1 : i32
    %197 = arith.cmpi eq, %arg1, %c1_i32_74 : i32
    %198 = arith.extui %197 : i1 to i32
    %c0_i32_75 = arith.constant 0 : i32
    %199 = arith.cmpi ne, %198, %c0_i32_75 : i32
    scf.if %199 {
      %c0_76 = arith.constant 0 : index
      %c0_77 = arith.constant 0 : index
      %200 = vector.load %arg15[%c0_76, %c0_77] : memref<1x32xf32, #tpu.memory_space<vmem>>, vector<1x32xf32>
      %c0_78 = arith.constant 0 : index
      %c0_79 = arith.constant 0 : index
      %201 = vector.load %arg16[%c0_78, %c0_79] : memref<1x32xf32, #tpu.memory_space<vmem>>, vector<1x32xf32>
      %cst_80 = arith.constant dense<0.000000e+00> : vector<1x8xf32>
      %202 = vector.multi_reduction <add>, %193, %cst_80 [2] : vector<1x8x32xf32> to vector<1x8xf32>
      %203 = vector.shape_cast %202 : vector<1x8xf32> to vector<1x8x1xf32>
      %cst_81 = arith.constant 3.200000e+01 : f32
      %204 = vector.broadcast %cst_81 : f32 to vector<1x8x1xf32>
      %205 = arith.divf %203, %204 : vector<1x8x1xf32>
      %206 = vector.broadcast %205 : vector<1x8x1xf32> to vector<1x8x32xf32>
      %207 = arith.subf %193, %206 : vector<1x8x32xf32>
      %208 = arith.mulf %207, %207 : vector<1x8x32xf32>
      %cst_82 = arith.constant dense<0.000000e+00> : vector<1x8xf32>
      %209 = vector.multi_reduction <add>, %208, %cst_82 [2] : vector<1x8x32xf32> to vector<1x8xf32>
      %210 = vector.shape_cast %209 : vector<1x8xf32> to vector<1x8x1xf32>
      %cst_83 = arith.constant 3.200000e+01 : f32
      %211 = vector.broadcast %cst_83 : f32 to vector<1x8x1xf32>
      %212 = arith.divf %210, %211 : vector<1x8x1xf32>
      %213 = vector.broadcast %205 : vector<1x8x1xf32> to vector<1x8x32xf32>
      %214 = arith.subf %193, %213 : vector<1x8x32xf32>
      %cst_84 = arith.constant 9.99999974E-6 : f32
      %215 = vector.broadcast %cst_84 : f32 to vector<1x8x1xf32>
      %216 = arith.addf %212, %215 : vector<1x8x1xf32>
      %217 = math.rsqrt %216 : vector<1x8x1xf32>
      %218 = vector.broadcast %217 : vector<1x8x1xf32> to vector<1x8x32xf32>
      %219 = arith.mulf %214, %218 : vector<1x8x32xf32>
      %220 = vector.shape_cast %200 : vector<1x32xf32> to vector<1x1x32xf32>
      %221 = vector.broadcast %220 : vector<1x1x32xf32> to vector<1x8x32xf32>
      %222 = arith.mulf %219, %221 : vector<1x8x32xf32>
      %223 = vector.shape_cast %201 : vector<1x32xf32> to vector<1x1x32xf32>
      %224 = vector.broadcast %223 : vector<1x1x32xf32> to vector<1x8x32xf32>
      %225 = arith.addf %222, %224 : vector<1x8x32xf32>
      %c0_85 = arith.constant 0 : index
      %c0_86 = arith.constant 0 : index
      %c0_87 = arith.constant 0 : index
      %226 = vector.load %arg17[%c0_85, %c0_86, %c0_87] : memref<1x8x32xf32, #tpu.memory_space<vmem>>, vector<1x8x32xf32>
      tpu.vector_store %arg17[%c0_85, %c0_86, %c0_87], %225 {strides = array<i32>} : memref<1x8x32xf32, #tpu.memory_space<vmem>>, vector<1x8x32xf32>,
    } else {
    }
    return
  }
  func.func @transform_0(%arg0: i32, %arg1: i32) -> (i32, i32, i32) {
    %c0_i32 = arith.constant 0 : i32
    %c0_i32_0 = arith.constant 0 : i32
    %c0_i32_1 = arith.constant 0 : i32
    return %arg0, %c0_i32, %c0_i32_0 : i32, i32, i32
  }
  func.func @transform_1(%arg0: i32, %arg1: i32) -> (i32, i32, i32) {
    %c0_i32 = arith.constant 0 : i32
    %c0_i32_0 = arith.constant 0 : i32
    %c0_i32_1 = arith.constant 0 : i32
    return %arg1, %c0_i32, %c0_i32_0 : i32, i32, i32
  }
  func.func @transform_2(%arg0: i32, %arg1: i32) -> (i32, i32, i32) {
    %c0_i32 = arith.constant 0 : i32
    %c0_i32_0 = arith.constant 0 : i32
    %c0_i32_1 = arith.constant 0 : i32
    return %arg1, %c0_i32, %c0_i32_0 : i32, i32, i32
  }
  func.func @transform_3(%arg0: i32, %arg1: i32) -> (i32, i32, i32) {
    %c0_i32 = arith.constant 0 : i32
    %c0_i32_0 = arith.constant 0 : i32
    %c0_i32_1 = arith.constant 0 : i32
    return %arg1, %c0_i32, %c0_i32_0 : i32, i32, i32
  }
  func.func @transform_4(%arg0: i32, %arg1: i32) -> (i32, i32, i32) {
    %c0_i32 = arith.constant 0 : i32
    %c0_i32_0 = arith.constant 0 : i32
    %c0_i32_1 = arith.constant 0 : i32
    return %arg1, %c0_i32, %c0_i32_0 : i32, i32, i32
  }
  func.func @transform_5(%arg0: i32, %arg1: i32) -> (i32, i32, i32) {
    %c0_i32 = arith.constant 0 : i32
    %c0_i32_0 = arith.constant 0 : i32
    %c0_i32_1 = arith.constant 0 : i32
    return %arg1, %c0_i32, %c0_i32_0 : i32, i32, i32
  }
  func.func @transform_6(%arg0: i32, %arg1: i32) -> (i32, i32, i32) {
    %c0_i32 = arith.constant 0 : i32
    %c0_i32_0 = arith.constant 0 : i32
    %c0_i32_1 = arith.constant 0 : i32
    return %arg1, %c0_i32, %c0_i32_0 : i32, i32, i32
  }
  func.func @transform_7(%arg0: i32, %arg1: i32) -> (i32, i32, i32) {
    %c0_i32 = arith.constant 0 : i32
    %c0_i32_0 = arith.constant 0 : i32
    %c0_i32_1 = arith.constant 0 : i32
    return %arg1, %c0_i32, %c0_i32_0 : i32, i32, i32
  }
  func.func @transform_8(%arg0: i32, %arg1: i32) -> (i32, i32, i32) {
    %c0_i32 = arith.constant 0 : i32
    %c0_i32_0 = arith.constant 0 : i32
    %c0_i32_1 = arith.constant 0 : i32
    return %arg1, %c0_i32, %c0_i32_0 : i32, i32, i32
  }
  func.func @transform_9(%arg0: i32, %arg1: i32) -> (i32, i32, i32) {
    %c0_i32 = arith.constant 0 : i32
    %c0_i32_0 = arith.constant 0 : i32
    %c0_i32_1 = arith.constant 0 : i32
    return %arg1, %c0_i32, %c0_i32_0 : i32, i32, i32
  }
  func.func @transform_10(%arg0: i32, %arg1: i32) -> (i32, i32, i32) {
    %c0_i32 = arith.constant 0 : i32
    %c0_i32_0 = arith.constant 0 : i32
    %c0_i32_1 = arith.constant 0 : i32
    return %arg1, %c0_i32, %c0_i32_0 : i32, i32, i32
  }
  func.func @transform_11(%arg0: i32, %arg1: i32) -> (i32, i32, i32) {
    %c0_i32 = arith.constant 0 : i32
    %c0_i32_0 = arith.constant 0 : i32
    %c0_i32_1 = arith.constant 0 : i32
    return %arg1, %c0_i32, %c0_i32_0 : i32, i32, i32
  }
  func.func @transform_12(%arg0: i32, %arg1: i32) -> (i32, i32, i32) {
    %c0_i32 = arith.constant 0 : i32
    %c0_i32_0 = arith.constant 0 : i32
    %c0_i32_1 = arith.constant 0 : i32
    return %arg1, %c0_i32, %c0_i32_0 : i32, i32, i32
  }
  func.func @transform_13(%arg0: i32, %arg1: i32) -> (i32, i32) {
    %c0_i32 = arith.constant 0 : i32
    %c0_i32_0 = arith.constant 0 : i32
    %c0_i32_1 = arith.constant 0 : i32
    return %c0_i32, %c0_i32_0 : i32, i32
  }
  func.func @transform_14(%arg0: i32, %arg1: i32) -> (i32, i32) {
    %c0_i32 = arith.constant 0 : i32
    %c0_i32_0 = arith.constant 0 : i32
    %c0_i32_1 = arith.constant 0 : i32
    return %c0_i32, %c0_i32_0 : i32, i32
  }
  func.func @transform_15(%arg0: i32, %arg1: i32) -> (i32, i32, i32) {
    %c0_i32 = arith.constant 0 : i32
    %c0_i32_0 = arith.constant 0 : i32
    %c0_i32_1 = arith.constant 0 : i32
    return %arg0, %c0_i32, %c0_i32_0 : i32, i32, i32
  }
}

</mosaic_0001>

<bundles_post_ra>
// kernel: tpu_custom_call.1
= control target key start
LH: loop header
LB: loop body
LE: loop exit
PB: predicated region body
PF: predicated region fallthrough
CT: control target
= control target key end

     0   :  { %s2652_s0 = inlined_call_operand.vmem [shape: f32[2,8,32], index: 0, kind: input, shape index: {}]   ;;  %s2653_s1 = inlined_call_operand.vmem [shape: f32[2,1,32], index: 1, kind: input, shape index: {}]   ;;  %s2654_s2 = inlined_call_operand.vmem [shape: f32[2,1,32], index: 2, kind: input, shape index: {}]   ;;  %s2655_s3 = inlined_call_operand.vmem [shape: bf16[2,32,96], index: 3, kind: input, shape index: {}]   ;;  %s2656_s4 = inlined_call_operand.vmem [shape: f32[2,1,96], index: 4, kind: input, shape index: {}]   ;;  %s2657_s5 = inlined_call_operand.vmem [shape: bf16[2,32,32], index: 5, kind: input, shape index: {}]   ;;  %s2658_s6 = inlined_call_operand.vmem [shape: f32[2,1,32], index: 6, kind: input, shape index: {}]   ;;  %s2659_s7 = inlined_call_operand.vmem [shape: f32[2,1,32], index: 7, kind: input, shape index: {}]   ;;  %s2660_s8 = inlined_call_operand.vmem [shape: f32[2,1,32], index: 8, kind: input, shape index: {}]   ;;  %s2661_s9 = inlined_call_operand.vmem [shape: bf16[2,32,128], index: 9, kind: input, shape index: {}]   ;;  %s2662_s10 = inlined_call_operand.vmem [shape: f32[2,1,128], index: 10, kind: input, shape index: {}]   ;;  %s2663_s11 = inlined_call_operand.vmem [shape: bf16[2,128,32], index: 11, kind: input, shape index: {}]   ;;  %s2664_s12 = inlined_call_operand.vmem [shape: f32[2,1,32], index: 12, kind: input, shape index: {}]   ;;  %s2665_s13 = inlined_call_operand.vmem [shape: f32[1,32], index: 13, kind: input, shape index: {}]   ;;  %s2666_s14 = inlined_call_operand.vmem [shape: f32[1,32], index: 14, kind: input, shape index: {}]   ;;  %s2667_s15 = inlined_call_operand.hbm [shape: f32[2,8,32], index: 15, kind: output, shape index: {}]  }
   0x1   :  { %2683 = sst [smem:[#allocation18_spill]] %s2652_s0 }
   0x2   :  { %2684 = sst [smem:[#allocation19_spill]] %s2655_s3 }
   0x3   :  { %2685 = sst [smem:[#allocation20_spill]] %s2657_s5 }
   0x4   :  { %2686 = sst [smem:[#allocation21_spill]] %s2659_s7 }
   0x5   :  { %2687 = sst [smem:[#allocation22_spill]] %s2663_s11 }
   0x6   :  { %2688 = sst [smem:[#allocation23_spill]] %s2665_s13 }
   0x7   :  { %2689 = sst [smem:[#allocation24_spill]] %s2666_s14 }
   0x8   :  { %2690 = sst [smem:[#allocation25_spill]] %s2667_s15 }
   0x9   :  { %20 = vsyncpa [#allocation3], 0 }
   0xa   :  { %22 = vsyncpa [#allocation3 + $0x1], 0  ;;  %s2291_s18 = smov 0   ;;  %s2293_s19 = smov 0  }
   0xb   :  { %s2295_s20 = smov 0   ;;  %s2297_s21 = smov 0  }
   0xc   :  { %s2299_s22 = smov 0   ;;  %s2301_s23 = smov 0  }
   0xd   :  { %s2303_s24 = smov 0   ;;  %s2305_s25 = smov 0  }
   0xe LB: > { %2691 = sst [smem:[#allocation5_spill]] %s2164_s18  ;;  %s1790_s26 = sadd.s32 4294967295, %s2192_s25   ;;  %s2192_s25 = sphi %s2305_s25, %s28_s25   ;;  %s2188_s24 = sphi %s2303_s24, %s2736_s24   ;;  %s2184_s23 = sphi %s2301_s23, %s2735_s23   ;;  %s2180_s22 = sphi %s2299_s22, %s2734_s22   ;;  %s2176_s21 = sphi %s2297_s21, %s2733_s21   ;;  %s2172_s20 = sphi %s2295_s20, %s2732_s20   ;;  %s2168_s19 = sphi %s2293_s19, %s2731_s19   ;;  %s2164_s18 = sphi %s2291_s18, %s2730_s18  }
   0xf   : > { %2692 = sst [smem:[#allocation6_spill]] %s2168_s19  ;;  %s1791_s27 = sadd.s32 4294967294, %s2192_s25  }
  0x10   : > { %2693 = sst [smem:[#allocation7_spill]] %s2172_s20  ;;  %s37_s28 = sadd.s32 1, %s2184_s23 }
  0x11   : > { %2694 = sst [smem:[#allocation8_spill]] %s2176_s21  ;;  %p38_p0 = scmp.ge.s32.totalorder %s37_s28, 2 }
  0x12   : > { %2695 = sst [smem:[#allocation9_spill]] %s2180_s22  ;;  %s40_s29 = sadd.s32 1, %s2188_s24 }
  0x13   : > { %2696 = sst [smem:[#allocation10_spill]] %s2184_s23  ;;  %p437_p1 = scmp.ne.s32.totalorder %s2172_s20, %s2168_s19 }
  0x14   : > { %2697 = sst [smem:[#allocation11_spill]] %s2188_s24  ;;  %p438_p2 = scmp.eq.s32.totalorder %s1790_s26, 3 }
  0x15   : > { %2698 = sst [smem:[#allocation12_spill]] %s2192_s25  ;;  %s2738_s28 = smov (%p38_p0, %s37_s28), 0 }
  0x16   : > { %2699 = sst [smem:[#allocation13_spill]] %s2738_s28  ;;  %s2740_s29 = smov (!%p38_p0, %s40_s29), %s2188_s24 }
  0x17   : > { %p2340_p3 = por %p438_p2, %p437_p1  ;;  %p443_p4 = scmp.ne.s32.totalorder %s2168_s19, %s2164_s18 }
  0x18   : > { %p42_p5 = scmp.ge.s32.totalorder %s2740_s29, 2  ;;  %p444_p6 = scmp.eq.s32.totalorder %s1791_s27, 3 }
  0x19   : > { %s2700_s30 = scalar_select %p2340_p3, 1, 0 }
  0x1a   : > { %p1794_p7 = scmp.ge.s32.totalorder %s2192_s25, 1  ;;  %p555_p8 = scmp.lt.s32.totalorder %s2192_s25, 5 }
  0x1b   : > { %2701 = sst [smem:[#allocation14_spill]] %s2700_s30  ;;  %s2742_s29 = smov (%p42_p5, %s2740_s29), 0 }
  0x1c   : > { %2702 = sst [smem:[#allocation15_spill]] %s2742_s29  ;;  %p2350_p9 = por %p444_p6, %p443_p4 }
  0x1d   : > { %p556_p10 = pnand %p1794_p7, %p555_p8  ;;  %s424_s17 = ssub.s32 %s2188_s24, %s2742_s29 }
  0x1e   : > { %s2703_s16 = scalar_select %p2350_p9, 1, 0 }
  0x1f   : > { %s427_s26 = sadd.s32 1, %s2172_s20  ;;  %p425_p11 = scmp.eq.s32.totalorder %s424_s17, 0 }
  0x20   : > { %2704 = sst [smem:[#allocation16_spill]] %s2703_s16  ;;  %559 = sbr.rel (%p556_p10) target bundleno = 2829 (0xb0d), region = 80 }
  0x21   : > { %s2358_s28 = scalar_select %p425_p11, %s2172_s20, %s427_s26  }
  0x22   : > { %s2673_s27 = sand.u32 (!%p556_p10), 1, %s2168_s19   ;;  %p646_p12 = scmp.lt.s32.totalorder (!%p556_p10), %s2180_s22, 1 }
  0x23   : > { %2705 = sst [smem:[#allocation17_spill]] %s2358_s28  ;;  %s1795_s23 = sshll.u32 (!%p556_p10), %s2673_s27, 3 }
  0x24   : > { %p650_p13 = scmp.lt.s32.totalorder (!%p556_p10), %s2176_s21, 1  ;;  %s2706_s0 = sld [smem:[#allocation18_spill]] (!%p556_p10) }
  0x25   : > { %s647_s18 = scalar_select %p646_p12, %s2180_s22, 1 }
  0x26   : > { %s2367_s16 = scalar_select %p650_p13, %s2176_s21, 1 }
  0x27   : > { %s1796_s17 = sshll.u32 %s647_s18, 3  ;;  %s2707_s3 = sld [smem:[#allocation19_spill]] }
  0x28   : > { %s1847_s19 = sshll.u32 %s2367_s16, 4  ;;  %s2708_s5 = sld [smem:[#allocation20_spill]] }
  0x29   : > { %s2410_s18 = scalar_lea.vmem %s2661_s9, %s1847_s19  ;;  %s685_s11 = scalar_lea.vmem %s2662_s10, %s2367_s16 }
  0x2a   : > { %s649_s24 = scalar_lea.vmem %s2706_s0, %s1796_s17  ;;  %s677_s0 = scalar_lea.vmem %s2660_s8, %s2367_s16 }
  0x2b   : > { %s693_s15 = scalar_lea.vmem %s2664_s12, %s2367_s16  ;;  %s2710_s20 = sld [smem:[#allocation22_spill]] }
  0x2c   : > { %s2426_s14 = scalar_lea.vmem [#allocation2], %s1795_s23  ;;  %s2711_s22 = sld [smem:[#allocation8_spill]] }
  0x2d   : > { %s2384_s13 = scalar_lea.vmem %s2707_s3, %s1847_s19 }
  0x2e   : > { %s2393_s26 = scalar_lea.vmem %s2708_s5, %s1847_s19  ;;  %s1850_s5 = sshll.u32 %s2367_s16, 6 }
  0x31   : > { %s2424_s7 = scalar_lea.vmem %s2710_s20, %s1850_s5 }
  0x32   : > { %p1805_p0 = scmp.ne.s32.totalorder %s2711_s22, 0 }
  0x34   : > { %698 = sbr.rel (%p1805_p0) target bundleno = 59 (0x3b), region = 84 }
  0x39   : > { %v699_v0 = vld [vmem:[%s649_s24] sm:$0xff]  ;;  %vm700_vm0 = vcmask 261120  }
  0x3a   : > { %701 = vst.msk [vmem:[%s2426_s14] sm:$0xff] %vm700_vm0, %v699_v0 }
  0x3b PF: > { %vm705_vm1 = vcmask 261120   ;;  %v2064_v8 = vld [vmem:[%s2384_s13 + $0x8] sm:$0xff]   ;;  %v2194_v9 = vmov 0.0   ;;  %vm2195_vm2 = vmmov 0   ;;  %v2065_v10 = vld [vmem:[%s2384_s13] sm:$0xff]   ;;  %s2712_s13 = scalar_lea.vmem %s2653_s1, %s2367_s16  ;;  %s2713_s23 = scalar_lea.vmem %s2654_s2, %s2367_s16  ;;  %vm810_vm3 = vcmask 64512  }
  0x3c   : > { %1885 = vmatprep.subr.bf16.mxu0 %v2194_v9  ;;  %1889 = vmatprep.mubr.msk.bf16.mxu0 %vm2195_vm2, %v2194_v9  ;;  %v1806_v15 = vld [vmem:[%s2712_s13] ss:$0 sm:$0xff]  ;;  %s2714_s29 = scalar_lea.vmem %s2656_s4, %s2367_s16  ;;  %s2196_s17 = smov 120   ;;  %v801_v39 = vlaneseq  ;;  %vm875_vm5 = vcmask 1043456   ;;  %vm1265_vm6 = vcmask 130048   ;;  %vm1267_vm7 = vcmask 195584  }
  0x3d   : > { %1886 = vmatpush3.bf16.msra.mxu0 %v2064_v8  ;;  %1905 = vmatprep.subr.bf16.mxu1 %v2194_v9  ;;  %v1807_v17 = vld [vmem:[%s2713_s23] ss:$0 sm:$0xff]  ;;  %s2197_s28 = smov 96   ;;  %s2198_s27 = smov 88  }
  0x3e   : > { %1887 = vmatprep.subr.bf16.mxu0 %v2194_v9  ;;  %1907 = vmatprep.mubr.msk.bf16.mxu1 %vm2195_vm2, %v2194_v9  ;;  %v1808_v21 = vld [vmem:[%s2714_s29] ss:$0 sm:$0xff]  ;;  %s2199_s30 = smov 80   ;;  %s2200_s25 = smov 112   ;;  %v802_v40 = vshrl.u32 %v801_v39, 7  ;;  %v804_v41 = vand.u32 127, %v801_v39 }
  0x3f   : > { %s2201_s22 = smov 72   ;;  %s2202_s3 = smov 104  }
  0x40   : > { %vm805_vm4 = vcmp.le.s32.totalorder %v804_v41, %v802_v40  ;;  %s2203_s5 = smov 64   ;;  %s2204_s13 = smov 56  }
  0x41   : > { %v2431_v1 = vld [vmem:[%s2426_s14] sm:$0xff]  ;;  %1888 = vmatpush3.bf16.msra.mxu0 %v2065_v10  ;;  %s2205_s19 = smov 48   ;;  %s2206_s20 = smov 40  }
  0x42   : > { %v706_v2 = vsel %vm705_vm1, %v2431_v1, 0.0  ;;  %1893 = vmatprep.subr.bf16.mxu0 %v2194_v9  ;;  %s2207_s23 = smov 8   ;;  %s2208_s24 = smov 16  }
  0x43   : > { %707 = vadd.xlane.f32.xlu0 %v706_v2  ;;  %s2209_s21 = smov 24  }
  0xcc   : > { %v708_v3 = vpop.xlane.xlu0 %707 }
  0xcd   : > { %v710_v4 = vmul.f32 0.03125, %v708_v3 }
  0xcf   : > { %v711_v5 = vsub.f32 %v2431_v1, %v710_v4 }
  0xd1   : > { %v712_v6 = vmul.f32 %v711_v5, %v711_v5 }
  0xd3   : > { %v713_v7 = vsel %vm705_vm1, %v712_v6, 0.0 }
  0xd4   : > { %714 = vadd.xlane.f32.xlu0 %v713_v7 }
 0x15d   : > { %v715_v11 = vpop.xlane.xlu0 %714 }
 0x15e   : > { %v716_v12 = vmul.f32 0.03125, %v715_v11 }
 0x160   : > { %v717_v13 = vadd.f32 1e-05, %v716_v12 }
 0x162   : > { %2078 = vrsqrt.f32 %v717_v13 }
 0x16f   : > { %v2079_v14 = vpop.eup %2078 }
 0x170   : > { %v719_v16 = vmul.f32 %v2079_v14, %v711_v5 }
 0x172   : > { %v726_v18 = vmul.f32 %v1806_v15, %v719_v16 }
 0x174   : > { %v733_v19 = vadd.f32 %v1807_v17, %v726_v18 }
 0x176   : > { %v734_v20 = vpack.c.bf16 %v733_v19, %v733_v19 }
 0x178   : > { %1890 = vmatmul.mubr.msk.bf16.vlgmr.msra.gmra.mxu0 %vm705_vm1, %v734_v20 }
 0x179   : > { %1895 = vmatprep.mubr.msk.bf16.mxu0 %vm2195_vm2, %v2194_v9 }
 0x238   : > { %v795_v22 = vpop.f32.mrf.mxu0 }
 0x239   : > { %v796_v23 = vadd.f32 %v1808_v21, %v795_v22 }
 0x23a   : > { %v1891_v24 = vpop.f32.mrf.mxu0 }
 0x23b   : > { %v2465_v25 = vpack.c.bf16 %v796_v23, %v796_v23 }
 0x23c   : > { %v798_v26 = vpop.f32.mrf.mxu0 }
 0x23d   : > { %919 = vrot.lane.b32.xlu0 %v2465_v25, %s2196_s17  ;;  %808 = vrot.lane.b32.xlu1 %v2465_v25, %s2197_s28  ;;  %s2715_s17 = scalar_lea.vmem %s2658_s6, %s2367_s16 }
 0x23e   : > { %v1892_v27 = vpop.f32.mrf.mxu0 }
 0x241   : > { %921 = vrot.lane.b32.xlu1 %v2465_v25, %s2198_s27  ;;  %s2716_s27 = sld [smem:[#allocation21_spill]] }
 0x245   : > { %1032 = vrot.lane.b32.xlu1 %v2465_v25, %s2199_s30 }
 0x247   : > { %s2717_s30 = scalar_lea.vmem %s2716_s27, %s2367_s16 }
 0x249   : > { %1030 = vrot.lane.b32.xlu1 %v2465_v25, %s2200_s25 }
 0x24d   : > { %1143 = vrot.lane.b32.xlu1 %v2465_v25, %s2201_s22 }
 0x251   : > { %1141 = vrot.lane.b32.xlu1 %v2465_v25, %s2202_s3 }
 0x2af   : > { %v809_v28 = vpop.permute.xlu1 %808  ;;  %v920_v33 = vpop.permute.xlu0 %919 }
 0x2b0   : > { %v815_v29 = vsel %vm810_vm3, %v809_v28, 0 }
 0x2b1   : > { %1894 = vmatpush3.bf16.xpose.msra.mxu0 %v815_v29 }
 0x2b2   : > { %1899 = vmatprep.subr.bf16.mxu0 %v2194_v9 }
 0x2b3   : > { %v922_v30 = vpop.permute.xlu1 %921 }
 0x2b4   : > { %v927_v31 = vsel %vm810_vm3, %v922_v30, 0 }
 0x2b5   : > { %1906 = vmatpush3.bf16.xpose.msra.mxu1 %v927_v31 }
 0x2b6   : > { %1917 = vmatprep.subr.bf16.mxu1 %v2194_v9 }
 0x2b7   : > { %v1033_v32 = vpop.permute.xlu1 %1032 }
 0x2b8   : > { %1896 = vmatmul.mubr.msk.bf16.vlgmr.msra.gmra.mxu0 %vm810_vm3, %v2465_v25  ;;  %v1038_v35 = vsel %vm810_vm3, %v1033_v32, 0 }
 0x2b9   : > { %1901 = vmatprep.mubr.msk.bf16.mxu0 %vm2195_vm2, %v2194_v9 }
 0x2bb   : > { %v1031_v34 = vpop.permute.xlu1 %1030 }
 0x2bc   : > { %1908 = vmatmul.mubr.msk.bf16.vlgmr.msra.gmra.mxu1 %vm810_vm3, %v920_v33 }
 0x2bd   : > { %1918 = vmatpush3.bf16.xpose.msra.mxu1 %v1038_v35  ;;  %1919 = vmatprep.mubr.msk.bf16.mxu1 %vm2195_vm2, %v2194_v9 }
 0x2be   : > { %1929 = vmatprep.subr.bf16.mxu1 %v2194_v9 }
 0x2bf   : > { %v1144_v36 = vpop.permute.xlu1 %1143 }
 0x2c0   : > { %v1149_v37 = vsel %vm810_vm3, %v1144_v36, 0 }
 0x2c3   : > { %v1142_v38 = vpop.permute.xlu1 %1141 }
 0x2c4   : > { %1920 = vmatmul.mubr.msk.bf16.vlgmr.msra.gmra.mxu1 %vm810_vm3, %v1031_v34 }
 0x2c5   : > { %1930 = vmatpush3.bf16.xpose.msra.mxu1 %v1149_v37  ;;  %1931 = vmatprep.mubr.msk.bf16.mxu1 %vm2195_vm2, %v2194_v9 }
 0x2c6   : > { %1941 = vmatprep.subr.bf16.mxu1 %v2194_v9 }
 0x2cc   : > { %1932 = vmatmul.mubr.msk.bf16.vlgmr.msra.gmra.mxu1 %vm810_vm3, %v1142_v38 }
 0x2cd   : > { %1945 = vmatprep.mubr.msk.bf16.mxu1 %vm2195_vm2, %v2194_v9 }
 0x378   : > { %v851_v42 = vpop.f32.mrf.mxu0 }
 0x379   : > { %v857_v43 = vsel %vm805_vm4, %v851_v42, -1e+30 }
 0x37a   : > { %v1897_v44 = vpop.f32.mrf.mxu0  ;;  %v858_v45 = vsel %vm810_vm3, %v857_v43, -inf }
 0x37b   : > { %859 = vmax.xlane.f32.xlu1 %v858_v45 }
 0x37c   : > { %v854_v46 = vpop.f32.mrf.mxu0  ;;  %v963_v47 = vpop.f32.mrf.mxu1 }
 0x37d   : > { %v969_v48 = vsel %vm805_vm4, %v963_v47, -1e+30 }
 0x37e   : > { %v1898_v49 = vpop.f32.mrf.mxu0  ;;  %v1909_v50 = vpop.f32.mrf.mxu1  ;;  %v970_v51 = vsel %vm810_vm3, %v969_v48, -inf }
 0x37f   : > { %971 = vmax.xlane.f32.xlu0 %v970_v51 }
 0x380   : > { %v966_v52 = vpop.f32.mrf.mxu1 }
 0x382   : > { %v1910_v53 = vpop.f32.mrf.mxu1 }
 0x384   : > { %v1074_v54 = vpop.f32.mrf.mxu1 }
 0x385   : > { %v1080_v55 = vsel %vm805_vm4, %v1074_v54, -1e+30 }
 0x386   : > { %v1921_v56 = vpop.f32.mrf.mxu1  ;;  %v1081_v57 = vsel %vm810_vm3, %v1080_v55, -inf }
 0x387   : > { %1082 = vmax.xlane.f32.xlu1 %v1081_v57  ;;  %v2066_v56 = vld [vmem:[%s2393_s26 + $0x8] sm:$0xff]   ;;  %v2067_v57 = vld [vmem:[%s2393_s26] sm:$0xff]  }
 0x388   : > { %v1077_v58 = vpop.f32.mrf.mxu1  ;;  %1942 = vmatpush3.bf16.msra.mxu1 %v2066_v56 }
 0x389   : > { %1943 = vmatprep.subr.bf16.mxu1 %v2194_v9 }
 0x38a   : > { %v1922_v59 = vpop.f32.mrf.mxu1 }
 0x38c   : > { %v1185_v60 = vpop.f32.mrf.mxu1  ;;  %1944 = vmatpush3.bf16.msra.mxu1 %v2067_v57 }
 0x38d   : > { %v1191_v61 = vsel %vm805_vm4, %v1185_v60, -1e+30  ;;  %1957 = vmatprep.subr.bf16.mxu1 %v2194_v9 }
 0x38e   : > { %v1933_v62 = vpop.f32.mrf.mxu1  ;;  %v1192_v63 = vsel %vm810_vm3, %v1191_v61, -inf }
 0x38f   : > { %1193 = vmax.xlane.f32.xlu0 %v1192_v63 }
 0x390   : > { %v1188_v0 = vpop.f32.mrf.mxu1 }
 0x392   : > { %v1934_v2 = vpop.f32.mrf.mxu1 }
 0x404   : > { %v860_v3 = vpop.xlane.xlu1 %859 }
 0x405   : > { %v861_v4 = vsub.f32 %v857_v43, %v860_v3 }
 0x407   : > { %v862_v5 = vmul.f32 1.442695, %v861_v4 }
 0x408   : > { %v972_v6 = vpop.xlane.xlu0 %971 }
 0x409   : > { %2080 = vpow2.f32 %v862_v5  ;;  %v973_v7 = vsub.f32 %v969_v48, %v972_v6 }
 0x40b   : > { %v974_v8 = vmul.f32 1.442695, %v973_v7 }
 0x40d   : > { %2082 = vpow2.f32 %v974_v8 }
 0x410   : > { %v1083_v19 = vpop.xlane.xlu1 %1082 }
 0x411   : > { %v1084_v20 = vsub.f32 %v1080_v55, %v1083_v19 }
 0x413   : > { %v1085_v21 = vmul.f32 1.442695, %v1084_v20 }
 0x416   : > { %v2081_v10 = vpop.eup %2080 }
 0x417   : > { %v864_v11 = vsel %vm810_vm3, %v2081_v10, 0.0 }
 0x418   : > { %v1194_v12 = vpop.xlane.xlu0 %1193  ;;  %865 = vadd.xlane.f32.xlu1 %v864_v11  ;;  %v1820_v11 = vld [vmem:[%s2715_s17] ss:$0 sm:$0xff] }
 0x419   : > { %v1195_v13 = vsub.f32 %v1191_v61, %v1194_v12 }
 0x41a   : > { %v2083_v14 = vpop.eup %2082 }
 0x41b   : > { %v1196_v15 = vmul.f32 1.442695, %v1195_v13  ;;  %v976_v16 = vsel %vm810_vm3, %v2083_v14, 0.0 }
 0x41c   : > { %977 = vadd.xlane.f32.xlu0 %v976_v16 }
 0x41d   : > { %2084 = vpow2.f32 %v1196_v15 }
 0x41e   : > { %2086 = vpow2.f32 %v1085_v21 }
 0x429   : > { %870 = vrot.lane.b32.xlu1 %v2465_v25, %s2203_s5 }
 0x42a   : > { %v2085_v17 = vpop.eup %2084 }
 0x42b   : > { %v1198_v18 = vsel %vm810_vm3, %v2085_v17, 0.0  ;;  %v2087_v22 = vpop.eup %2086 }
 0x42c   : > { %1199 = vadd.xlane.f32.xlu0 %v1198_v18  ;;  %v1087_v23 = vsel %vm810_vm3, %v2087_v22, 0.0 }
 0x442   : > { %982 = vrot.lane.b32.xlu0 %v2465_v25, %s2204_s13 }
 0x44d   : > { %1088 = vadd.xlane.f32.xlu1 %v1087_v23 }
 0x45e   : > { %1093 = vrot.lane.b32.xlu1 %v2465_v25, %s2205_s19 }
 0x462   : > { %1204 = vrot.lane.b32.xlu1 %v2465_v25, %s2206_s20 }
 0x4a1   : > { %v866_v24 = vpop.xlane.xlu1 %865 }
 0x4a2   : > { %2088 = vrcp.f32 %v866_v24  ;;  %v2069_v24 = vld [vmem:[%s2410_s18] sm:$0xff]  }
 0x4a5   : > { %v978_v26 = vpop.xlane.xlu0 %977  ;;  %v871_v27 = vpop.permute.xlu1 %870 }
 0x4a6   : > { %v877_v28 = vsel %vm875_vm5, %v871_v27, 0  ;;  %2090 = vrcp.f32 %v978_v26  ;;  %v2070_v26 = vld [vmem:[%s2424_s7 + $0x38] sm:$0xff]   ;;  %v2071_v27 = vld [vmem:[%s2424_s7 + $0x30] sm:$0xff]  }
 0x4a7   : > { %1900 = vmatpush3.bf16.msra.mxu0 %v877_v28  ;;  %v2072_v28 = vld [vmem:[%s2424_s7 + $0x28] sm:$0xff]  }
 0x4a8   : > { %1911 = vmatprep.subr.bf16.mxu0 %v2194_v9 }
 0x4af   : > { %v2089_v29 = vpop.eup %2088 }
 0x4b0   : > { %v868_v30 = vmul.f32 %v2089_v29, %v2081_v10  ;;  %v2073_v29 = vld [vmem:[%s2424_s7 + $0x20] sm:$0xff]  }
 0x4b2   : > { %v869_v31 = vpack.c.bf16 %v868_v30, %v868_v30  ;;  %v2074_v30 = vld [vmem:[%s2424_s7 + $0x18] sm:$0xff]  }
 0x4b3   : > { %v2091_v32 = vpop.eup %2090 }
 0x4b4   : > { %1902 = vmatmul.mubr.msk.bf16.vlgmr.msra.gmra.mxu0 %vm810_vm3, %v869_v31  ;;  %v980_v25 = vmul.f32 %v2091_v32, %v2083_v14  ;;  %v2075_v31 = vld [vmem:[%s2424_s7 + $0x10] sm:$0xff]  }
 0x4b5   : > { %v1200_v33 = vpop.xlane.xlu0 %1199  ;;  %1913 = vmatprep.mubr.msk.bf16.mxu0 %vm2195_vm2, %v2194_v9 }
 0x4b6   : > { %v981_v36 = vpack.c.bf16 %v980_v25, %v980_v25 }
 0x4b9   : > { %v983_v34 = vpop.permute.xlu0 %982 }
 0x4ba   : > { %v988_v35 = vsel %vm875_vm5, %v983_v34, 0 }
 0x4bb   : > { %1912 = vmatpush3.bf16.msra.mxu0 %v988_v35  ;;  %v1824_v35 = vld [vmem:[%s2717_s30] ss:$0 sm:$0xff] }
 0x4bc   : > { %1923 = vmatprep.subr.bf16.mxu0 %v2194_v9 }
 0x4be   : > { %1914 = vmatmul.mubr.msk.bf16.vlgmr.msra.gmra.mxu0 %vm810_vm3, %v981_v36 }
 0x4bf   : > { %1925 = vmatprep.mubr.msk.bf16.mxu0 %vm2195_vm2, %v2194_v9 }
 0x4d6   : > { %v1089_v37 = vpop.xlane.xlu1 %1088 }
 0x4d7   : > { %2092 = vrcp.f32 %v1089_v37  ;;  %v1825_v37 = vld [vmem:[%s677_s0] ss:$0 sm:$0xff] }
 0x4d8   : > { %2094 = vrcp.f32 %v1200_v33 }
 0x4da   : > { %v1094_v38 = vpop.permute.xlu1 %1093 }
 0x4db   : > { %v1099_v39 = vsel %vm875_vm5, %v1094_v38, 0 }
 0x4dc   : > { %1924 = vmatpush3.bf16.msra.mxu0 %v1099_v39 }
 0x4dd   : > { %1935 = vmatprep.subr.bf16.mxu0 %v2194_v9 }
 0x4de   : > { %v1205_v42 = vpop.permute.xlu1 %1204 }
 0x4df   : > { %v1210_v45 = vsel %vm875_vm5, %v1205_v42, 0  ;;  %v2077_v42 = vld [vmem:[%s2424_s7] sm:$0xff]  }
 0x4e4   : > { %v2093_v40 = vpop.eup %2092 }
 0x4e5   : > { %v1091_v41 = vmul.f32 %v2093_v40, %v2087_v22  ;;  %v2095_v44 = vpop.eup %2094 }
 0x4e6   : > { %v1202_v46 = vmul.f32 %v2095_v44, %v2085_v17 }
 0x4e7   : > { %v1092_v43 = vpack.c.bf16 %v1091_v41, %v1091_v41  ;;  %v2076_v41 = vld [vmem:[%s2424_s7 + $0x8] sm:$0xff]   ;;  %s2718_s7 = sld [smem:[#allocation8_spill]] }
 0x4e8   : > { %v1203_v47 = vpack.c.bf16 %v1202_v46, %v1202_v46 }
 0x4e9   : > { %1926 = vmatmul.mubr.msk.bf16.vlgmr.msra.gmra.mxu0 %vm810_vm3, %v1092_v43  ;;  %v1826_v43 = vld [vmem:[%s685_s11] ss:$0 sm:$0xff] }
 0x4ea   : > { %1936 = vmatpush3.bf16.msra.mxu0 %v1210_v45  ;;  %1937 = vmatprep.mubr.msk.bf16.mxu0 %vm2195_vm2, %v2194_v9 }
 0x4eb   : > { %1949 = vmatprep.subr.bf16.mxu0 %v2194_v9 }
 0x4ed   : > { %p1839_p1 = scmp.ge.s32.totalorder %s2718_s7, 1 }
 0x4f1   : > { %1938 = vmatmul.mubr.msk.bf16.vlgmr.msra.gmra.mxu0 %vm810_vm3, %v1203_v47 }
 0x4f2   : > { %1953 = vmatprep.mubr.msk.bf16.mxu0 %vm2195_vm2, %v2194_v9 }
 0x574   : > { %v913_v48 = vpop.f32.mrf.mxu0 }
 0x576   : > { %v1903_v49 = vpop.f32.mrf.mxu0 }
 0x578   : > { %v916_v50 = vpop.f32.mrf.mxu0 }
 0x57a   : > { %v1904_v51 = vpop.f32.mrf.mxu0 }
 0x57e   : > { %v1024_v52 = vpop.f32.mrf.mxu0 }
 0x57f   : > { %1253 = vrot.lane.b32.xlu0 %v1024_v52, %s2207_s23 }
 0x580   : > { %v1915_v53 = vpop.f32.mrf.mxu0 }
 0x582   : > { %v1027_v54 = vpop.f32.mrf.mxu0 }
 0x584   : > { %v1916_v55 = vpop.f32.mrf.mxu0 }
 0x5a9   : > { %v1135_v58 = vpop.f32.mrf.mxu0 }
 0x5aa   : > { %1257 = vrot.lane.b32.xlu1 %v1135_v58, %s2208_s24 }
 0x5ab   : > { %v1927_v59 = vpop.f32.mrf.mxu0 }
 0x5ad   : > { %v1138_v60 = vpop.f32.mrf.mxu0 }
 0x5af   : > { %v1928_v61 = vpop.f32.mrf.mxu0 }
 0x5b1   : > { %v1246_v62 = vpop.f32.mrf.mxu0 }
 0x5b2   : > { %1261 = vrot.lane.b32.xlu0 %v1246_v62, %s2209_s21 }
 0x5b3   : > { %v1939_v63 = vpop.f32.mrf.mxu0 }
 0x5b5   : > { %v1249_v0 = vpop.f32.mrf.mxu0 }
 0x5b7   : > { %v1940_v2 = vpop.f32.mrf.mxu0 }
 0x5f1   : > { %v1254_v3 = vpop.permute.xlu0 %1253 }
 0x5f2   : > { %v1264_v5 = vsel %vm810_vm3, %v913_v48, %v1254_v3 }
 0x61c   : > { %v1258_v4 = vpop.permute.xlu1 %1257 }
 0x61d   : > { %v1266_v6 = vsel %vm1265_vm6, %v1264_v5, %v1258_v4 }
 0x624   : > { %v1262_v7 = vpop.permute.xlu0 %1261 }
 0x625   : > { %v1268_v8 = vsel %vm1267_vm7, %v1266_v6, %v1262_v7 }
 0x626   : > { %v1269_v10 = vpack.c.bf16 %v1268_v8, %v1268_v8 }
 0x628   : > { %1946 = vmatmul.mubr.msk.bf16.vlgmr.msra.gmra.mxu1 %vm705_vm1, %v1269_v10 }
 0x629   : > { %1973 = vmatprep.mubr.msk.bf16.mxu1 %vm2195_vm2, %v2194_v9  ;;  %1958 = vmatpush3.bf16.msra.mxu1 %v2070_v26 }
 0x62a   : > { %1959 = vmatprep.subr.bf16.mxu1 %v2194_v9 }
 0x62d   : > { %1960 = vmatpush3.bf16.msra.mxu1 %v2071_v27 }
 0x62e   : > { %1961 = vmatprep.subr.bf16.mxu1 %v2194_v9 }
 0x631   : > { %1962 = vmatpush3.bf16.msra.mxu1 %v2072_v28 }
 0x632   : > { %1963 = vmatprep.subr.bf16.mxu1 %v2194_v9 }
 0x635   : > { %1964 = vmatpush3.bf16.msra.mxu1 %v2073_v29 }
 0x636   : > { %1965 = vmatprep.subr.bf16.mxu1 %v2194_v9 }
 0x639   : > { %1966 = vmatpush3.bf16.msra.mxu1 %v2074_v30 }
 0x63a   : > { %1967 = vmatprep.subr.bf16.mxu1 %v2194_v9 }
 0x63d   : > { %1968 = vmatpush3.bf16.msra.mxu1 %v2075_v31 }
 0x63e   : > { %1969 = vmatprep.subr.bf16.mxu1 %v2194_v9 }
 0x641   : > { %1970 = vmatpush3.bf16.msra.mxu1 %v2076_v41 }
 0x642   : > { %1971 = vmatprep.subr.bf16.mxu1 %v2194_v9 }
 0x645   : > { %1972 = vmatpush3.bf16.msra.mxu1 %v2077_v42 }
 0x6e8   : > { %v1330_v12 = vpop.f32.mrf.mxu1 }
 0x6e9   : > { %v1331_v13 = vadd.f32 %v1820_v11, %v1330_v12 }
 0x6ea   : > { %v1947_v14 = vpop.f32.mrf.mxu1 }
 0x6eb   : > { %v2545_v15 = vadd.f32 %v1331_v13, %v2431_v1  ;;  %v2068_v1 = vld [vmem:[%s2410_s18 + $0x8] sm:$0xff]  }
 0x6ec   : > { %v1333_v16 = vpop.f32.mrf.mxu1  ;;  %1950 = vmatpush3.bf16.msra.mxu0 %v2068_v1 }
 0x6ed   : > { %v1339_v17 = vsel %vm705_vm1, %v2545_v15, 0.0  ;;  %1951 = vmatprep.subr.bf16.mxu0 %v2194_v9  ;;  %v1830_v9 = vld [vmem:[%s693_s15] ss:$0 sm:$0xff] }
 0x6ee   : > { %1340 = vadd.xlane.f32.xlu1 %v1339_v17  ;;  %v1948_v18 = vpop.f32.mrf.mxu1 }
 0x6f0   : > { %1952 = vmatpush3.bf16.msra.mxu0 %v2069_v24 }
 0x777   : > { %v1341_v19 = vpop.xlane.xlu1 %1340 }
 0x778   : > { %v1342_v20 = vmul.f32 0.03125, %v1341_v19 }
 0x77a   : > { %v1343_v21 = vsub.f32 %v2545_v15, %v1342_v20 }
 0x77c   : > { %v1344_v22 = vmul.f32 %v1343_v21, %v1343_v21 }
 0x77e   : > { %v1345_v23 = vsel %vm705_vm1, %v1344_v22, 0.0 }
 0x77f   : > { %1346 = vadd.xlane.f32.xlu0 %v1345_v23 }
 0x808   : > { %v1347_v32 = vpop.xlane.xlu0 %1346 }
 0x809   : > { %v1348_v33 = vmul.f32 0.03125, %v1347_v32 }
 0x80b   : > { %v1349_v25 = vadd.f32 1e-05, %v1348_v33 }
 0x80d   : > { %2096 = vrsqrt.f32 %v1349_v25 }
 0x81a   : > { %v2097_v34 = vpop.eup %2096 }
 0x81b   : > { %v1351_v36 = vmul.f32 %v2097_v34, %v1343_v21 }
 0x81d   : > { %v1358_v38 = vmul.f32 %v1824_v35, %v1351_v36 }
 0x81f   : > { %v1365_v39 = vadd.f32 %v1825_v37, %v1358_v38 }
 0x821   : > { %v1366_v40 = vpack.c.bf16 %v1365_v39, %v1365_v39 }
 0x823   : > { %1954 = vmatmul.mubr.msk.bf16.vlgmr.msra.gmra.mxu0 %vm705_vm1, %v1366_v40 }
 0x8e3   : > { %v1427_v44 = vpop.f32.mrf.mxu0 }
 0x8e4   : > { %v1428_v45 = vadd.f32 %v1826_v43, %v1427_v44 }
 0x8e5   : > { %v1955_v46 = vpop.f32.mrf.mxu0 }
 0x8e6   : > { %v1433_v47 = vmax.f32 %v1428_v45, 0.0 }
 0x8e7   : > { %v1430_v48 = vpop.f32.mrf.mxu0 }
 0x8e8   : > { %v1434_v49 = vpack.c.bf16 %v1433_v47, %v1433_v47 }
 0x8e9   : > { %v1956_v50 = vpop.f32.mrf.mxu0 }
 0x8ea   : > { %1974 = vmatmul.mubr.bf16.vlgmr.msra.gmra.mxu1 %v1434_v49 }
 0x9aa   : > { %v1540_v51 = vpop.f32.mrf.mxu1 }
 0x9ab   : > { %v1541_v52 = vadd.f32 %v1830_v9, %v1540_v51 }
 0x9ac   : > { %v1975_v53 = vpop.f32.mrf.mxu1  ;;  %1550 = sbr.rel (%p1839_p1) target bundleno = 2482 (0x9b2), region = 88 }
 0x9ad   : > { %v1546_v54 = vadd.f32 %v1541_v52, %v2545_v15 }
 0x9ae   : > { %v1543_v55 = vpop.f32.mrf.mxu1 }
 0x9b0   : > { %v1976_v56 = vpop.f32.mrf.mxu1 }
 0x9b1   : > { %1551 = vst.msk [vmem:[%s2426_s14] sm:$0xff] %vm705_vm1, %v1546_v54 }
 0x9b2 PF: > { %s2719_s11 = sld [smem:[#allocation8_spill]] }
 0x9b8   : > { %p1840_p2 = scmp.ne.s32.totalorder %s2719_s11, 1 }
 0x9b9   : > { %s2720_s19 = sld [smem:[#allocation23_spill]] (!%p1840_p2) }
 0x9ba   : > { %1555 = sbr.rel (%p1840_p2) target bundleno = 2804 (0xaf4), region = 92  ;;  %s2721_s24 = sld [smem:[#allocation24_spill]] (!%p1840_p2) }
 0x9bf   : > { %v1558_v57 = vsel %vm705_vm1, %v1546_v54, 0.0  ;;  %v1841_v4 = vld [vmem:[%s2720_s19] ss:$0 sm:$0xff] }
 0x9c0   : > { %1559 = vadd.xlane.f32.xlu0 %v1558_v57  ;;  %v1842_v6 = vld [vmem:[%s2721_s24] ss:$0 sm:$0xff] }
 0xa49   : > { %v1560_v58 = vpop.xlane.xlu0 %1559 }
 0xa4a   : > { %v1561_v59 = vmul.f32 0.03125, %v1560_v58 }
 0xa4c   : > { %v1562_v60 = vsub.f32 %v1546_v54, %v1561_v59 }
 0xa4e   : > { %v1563_v61 = vmul.f32 %v1562_v60, %v1562_v60 }
 0xa50   : > { %v1564_v62 = vsel %vm705_vm1, %v1563_v61, 0.0 }
 0xa51   : > { %1565 = vadd.xlane.f32.xlu0 %v1564_v62 }
 0xada   : > { %v1566_v63 = vpop.xlane.xlu0 %1565 }
 0xadb   : > { %v1567_v0 = vmul.f32 0.03125, %v1566_v63 }
 0xadd   : > { %v1568_v2 = vadd.f32 1e-05, %v1567_v0 }
 0xadf   : > { %2098 = vrsqrt.f32 %v1568_v2 }
 0xaec   : > { %v2099_v3 = vpop.eup %2098 }
 0xaed   : > { %v1570_v5 = vmul.f32 %v2099_v3, %v1562_v60 }
 0xaef   : > { %v1577_v7 = vmul.f32 %v1841_v4, %v1570_v5 }
 0xaf1   : > { %v1584_v8 = vadd.f32 %v1842_v6, %v1577_v7 }
 0xaf3   : > { %1585 = vst.msk [vmem:[%s2426_s14] sm:$0xff] %vm705_vm1, %v1584_v8 }
 0xaf4 PF: > { %s2722_s21 = sld [smem:[#allocation9_spill]]  ;;  %s1600_s25 = sshll.u32 %s2426_s14, 4  ;;  %s1601_s25 = int_to_ptr.vmem [resolvable:$true] %s1600_s25 }
 0xaf5   : > { %s2723_s26 = sld [smem:[#allocation6_spill]]  ;;  %s2100_s5 = scalar_lea.vmem %s1601_s25, 128 }
 0xaf6   : > { %s2725_s27 = sld [smem:[#allocation25_spill]]  ;;  %p2101_p4 = scmp.ne.s32.totalorder %s1601_s25, %s2100_s5 }
 0xaf7   : > { %s2210_s0 = smov [#allocation2]  }
 0xaf8   : > { %p2102_p5 = pnand %p2101_p4, %p2340_p3  ;;  %s2104_s13 = sshll.u32 %s2210_s0, 4  ;;  %s2105_s13 = int_to_ptr.vmem [resolvable:$false] %s2104_s13 }
 0xaf9   : > { %s2106_s7 = scalar_lea.vmem %s2105_s13, 256  ;;  %p2107_p7 = scmp.lt.s32.totalorder %s1601_s25, %s2105_s13 }
 0xafa   : > { %s1844_s17 = sshll.u32 %s2722_s21, 7  ;;  %p2103_p6 = pneg %p2102_p5 }
 0xafb   : > { %s2726_s22 = sand.u32 1, %s2723_s26   ;;  %p2108_p8 = scmp.lt.s32.totalorder %s2106_s7, %s2100_s5 }
 0xafc   : > { %s1598_s30 = scalar_lea.hbm %s2725_s27, %s1844_s17  ;;  %s1587_s3 = scalar_lea.sflag [#allocation3], %s2726_s22 }
 0xafd   : > { %p2109_p10 = por %p2108_p8, %p2107_p7 }
 0xaff   : > { %p2110_p11 = pnand %p2109_p10, %p2103_p6 }
 0xb01   : > { %2113 = shalt.err (!%p2110_p11)
}
 0xb02   : > { %s2114_s11 = scalar_lea.hbm %s1598_s30, 128  ;;  %s2118_s15 = scalar_lea.hbm %s2725_s27, 256 }
 0xb03   : > { %p2115_p12 = scmp.ne.s32.totalorder %s1598_s30, %s2114_s11  ;;  %p2119_p1 = scmp.lt.s32.totalorder %s1598_s30, %s2725_s27 }
 0xb04   : > { %p2120_p2 = scmp.lt.s32.totalorder %s2118_s15, %s2114_s11 }
 0xb05   : > { %p2116_p13 = pnand %p2115_p12, %p2340_p3 }
 0xb06   : > { %p2121_p4 = por %p2120_p2, %p2119_p1 }
 0xb07   : > { %p2117_p0 = pneg %p2116_p13 }
 0xb09   : > { %p2122_p5 = pnand %p2121_p4, %p2117_p0 }
 0xb0b   : > { %2125 = shalt.err (!%p2122_p5)
}
 0xb0c   : > { %1977 = dma.vmem_to_hbm [thread:$0]  (%p2340_p3), %s1601_s25, 128, %s1598_s30, %s1587_s3  }
 0xb0d PF: > { %s2727_s23 = sld [smem:[#allocation12_spill]] }
 0xb0e   : > { %s2728_s24 = sld [smem:[#allocation5_spill]] }
 0xb13   : > { %p1983_p6 = scmp.ge.s32.totalorder %s2727_s23, 2 }
 0xb14   : > { %s1612_s26 = sand.u32 1, %s2728_s24  }
 0xb15   : > { %p1980_p7 = pnand %p1983_p6, %p2350_p9  ;;  %s1613_s17 = scalar_lea.sflag [#allocation3], %s1612_s26 }
 0xb17   : > { %p1981_p8 = pneg %p1980_p7 }
 0xb19   : > { %2159 = dma.done.wait (%p1981_p8), %s1613_s17, 128  }
 0xb1a   : > { %2161 = vsyncadd (%p1981_p8), %s1613_s17, 4294967168  ;;  %s28_s25 = sadd.s32 1, %s2727_s23   ;;  %s2730_s18 = sld [smem:[#allocation6_spill]] }
 0xb1b   : > { %p25_p10 = scmp.ge.s32.totalorder %s28_s25, 6   ;;  %s2731_s19 = sld [smem:[#allocation7_spill]] }
 0xb1c   : > { %s2732_s20 = sld [smem:[#allocation17_spill]] }
 0xb1d   : > { %s2733_s21 = sld [smem:[#allocation10_spill]]  ;;  %27 = sbr.rel (!%p25_p10) target bundleno = 14 (0xe), region = 163 }
 0xb1e   : > { %s2734_s22 = sld [smem:[#allocation11_spill]] }
 0xb1f   : > { %s2735_s23 = sld [smem:[#allocation13_spill]] }
 0xb20   : > { %s2736_s24 = sld [smem:[#allocation15_spill]] }
 0xb22   :  { %1618 = vsyncpa [#allocation3], 1 }
 0xb23   :  { %1620 = vsyncpa [#allocation3 + $0x1], 1 }

</bundles_post_ra>
